<compile_context>
chip_gen: v6e
topology: v6e:2x2x1
jax: 0.10.0
libtpu: 0.0.40
codegen_flags: <defaults>
</compile_context>

<pallas_src>
import functools

import numpy as np
import jax
import jax.numpy as jnp
from jax.experimental import pallas as pl
from jax.experimental.pallas import tpu as pltpu


def _round_up(n, m):
    return ((n + m - 1) // m) * m


def _cdiv(a, b):
    return (a + b - 1) // b


def _posenc_kernel(x_ref, e_ref, bias_ref, mask_ref, o_ref, *, include_input):
    # x_ref:    (TP, k*D)          packed input rows (k original rows / packed row)
    # e_ref:    (k*D, k*out_dim)   block-diagonal expansion, one nonzero per column
    # bias_ref: (1, k*out_dim)     phase bias: 0 for sin/passthrough, pi/2 for cos
    # mask_ref: (1, k*out_dim)     1.0 on passthrough (raw x) columns
    # o_ref:    (TP, k*out_dim)    packed output, already in final column order
    value = jnp.dot(
        x_ref[...], e_ref[...],
        precision=jax.lax.Precision.HIGHEST,
        preferred_element_type=jnp.float32,
    )
    out = jnp.sin(value + jnp.broadcast_to(bias_ref[...], value.shape))
    if include_input:
        keep = jnp.broadcast_to(mask_ref[...], value.shape) > 0.5
        out = jnp.where(keep, value, out)
    # Single lane-dense full-tile store.
    o_ref[...] = out


def _column_layout(input_dim, encoding_functions, sigmas, include_input):
    """Per-original-row column layout: (src_dim, scale, phase_bias, passthrough)."""
    D, F = input_dim, encoding_functions
    bands = np.linspace(0.0, F - 1, F, dtype=np.float64) / F
    cols = []
    if include_input:
        for d in range(D):
            cols.append((d, 1.0, 0.0, True))
    for sigma in sigmas:
        scale = 2.0 * np.pi * (float(sigma) ** bands)
        for b in (0.0, np.pi / 2.0):          # sin block, then cos = sin(. + pi/2)
            for d in range(D):
                for f in range(F):
                    cols.append((d, float(scale[f]), b, False))
    return cols


def make_positional_encoding(input_dim=3, encoding_functions=6, sigmas=(2.0,),
                             include_input=True, pack=16, packed_row_tile=1024):
    """Returns (apply_fn, out_dim). apply_fn(x) with x of shape (N, input_dim)."""
    D = input_dim
    cols = _column_layout(D, encoding_functions, sigmas, include_input)
    out_dim = len(cols)
    k = pack
    in_cols = k * D
    out_cols = k * out_dim

    # Block-diagonal expansion matrix (one nonzero per column) + bias/mask rows,
    # all in the final packed, row-major output column order.
    emat = np.zeros((in_cols, out_cols), dtype=np.float64)
    bias = np.zeros((1, out_cols), dtype=np.float32)
    mask = np.zeros((1, out_cols), dtype=np.float32)
    for r in range(k):
        for j, (d, s, b, passthrough) in enumerate(cols):
            c = r * out_dim + j
            emat[r * D + d, c] = s
            bias[0, c] = b
            mask[0, c] = 1.0 if passthrough else 0.0

    emat_dev = jnp.asarray(emat.astype(np.float32))   # hoisted, created once
    bias_dev = jnp.asarray(bias)
    mask_dev = jnp.asarray(mask)

    kernel = functools.partial(_posenc_kernel, include_input=include_input)

    @jax.jit
    def apply(x):
        assert x.ndim == 2 and x.shape[1] == D, x.shape
        n = x.shape[0]
        x = x.astype(jnp.float32)

        # Packed-row count and tile: multiple of 8 (sublane), >= 2 grid steps
        # when possible so v7x's two TensorCores are both used.
        p = _cdiv(max(n, 1), k)
        tp = min(packed_row_tile, _round_up(_cdiv(p, 2), 8))
        p_pad = _round_up(p, tp)
        n_pad = p_pad * k
        padded = n_pad != n
        if padded:
            x = jnp.pad(x, ((0, n_pad - n), (0, 0)))
        xp = x.reshape(p_pad, in_cols)          # free row-major reshape

        grid = (p_pad // tp,)
        outp = pl.pallas_call(
            kernel,
            out_shape=jax.ShapeDtypeStruct((p_pad, out_cols), jnp.float32),
            grid=grid,
            in_specs=[
                pl.BlockSpec((tp, in_cols), lambda i: (i, 0)),
                pl.BlockSpec((in_cols, out_cols), lambda i: (0, 0)),
                pl.BlockSpec((1, out_cols), lambda i: (0, 0)),
                pl.BlockSpec((1, out_cols), lambda i: (0, 0)),
            ],
            out_specs=pl.BlockSpec((tp, out_cols), lambda i: (i, 0)),
            compiler_params=pltpu.CompilerParams(
                dimension_semantics=("parallel",)),
        )(xp, emat_dev, bias_dev, mask_dev)

        out = outp.reshape(n_pad, out_dim)      # free row-major reshape
        if padded:
            # TODO(synk): a masked tail store inside the kernel would avoid this
            # extra output slice pass for ragged N; aligned N skips it entirely.
            out = out[:n]
        return out

    return apply, out_dim


def _reference_numpy(x, input_dim=3, encoding_functions=6, sigmas=(2.0,),
                     include_input=True):
    """Pure-numpy transcription of the PyTorch forward (for verification)."""
    F = encoding_functions
    bands = (np.linspace(0.0, F - 1, F, dtype=np.float64) / F)[None, :]
    enc = []
    if include_input:
        enc.append(np.asarray(x, dtype=np.float32))
    for sigma in sigmas:
        value = 2.0 * np.pi * np.asarray(x, np.float64)[..., None] * (float(sigma) ** bands)
        value = value.reshape(x.shape[0], -1)
        enc.append(np.sin(value).astype(np.float32))
        enc.append(np.cos(value).astype(np.float32))
    return np.concatenate(enc, axis=-1).astype(np.float32)


if __name__ == "__main__":
    key = jax.random.PRNGKey(0)
    k1, k2, k3 = jax.random.split(key, 3)
    D = 3

    # --- Test 1: module defaults, tiny N (pack-padding + output slice path) ---
    x1 = jax.random.normal(k1, (8, D), dtype=jnp.float32)
    apply1, dim1 = make_positional_encoding(
        input_dim=D, encoding_functions=6, sigmas=(2.0,), include_input=True)
    out1 = jax.block_until_ready(apply1(x1))
    ref1 = _reference_numpy(np.asarray(x1), D, 6, (2.0,), True)
    assert out1.shape == (8, dim1), (out1.shape, dim1)
    np.testing.assert_allclose(np.asarray(out1), ref1, rtol=3e-5, atol=3e-5)

    # --- Test 2: aligned N (no pad, no slice), 2-step grid ---
    x2 = jax.random.normal(k2, (256, D), dtype=jnp.float32)
    out2 = jax.block_until_ready(apply1(x2))
    ref2 = _reference_numpy(np.asarray(x2), D, 6, (2.0,), True)
    assert out2.shape == (256, dim1), (out2.shape, dim1)
    np.testing.assert_allclose(np.asarray(out2), ref2, rtol=3e-5, atol=3e-5)

    # --- Test 3: ragged N, multiple sigmas ---
    x3 = jax.random.normal(k3, (300, D), dtype=jnp.float32)
    apply3, dim3 = make_positional_encoding(
        input_dim=D, encoding_functions=6, sigmas=(1.0, 2.0), include_input=True)
    out3 = jax.block_until_ready(apply3(x3))
    ref3 = _reference_numpy(np.asarray(x3), D, 6, (1.0, 2.0), True)
    assert out3.shape == (300, dim3), (out3.shape, dim3)
    np.testing.assert_allclose(np.asarray(out3), ref3, rtol=3e-5, atol=3e-5)

    print("KERNEL_OK")
</pallas_src>

<mosaic_0001>
module attributes {stable_mosaic.version = 11 : i64} {
  func.func @_posenc_kernel(%arg0: i32, %arg1: memref<8x48xf32, #tpu.memory_space<vmem>>, %arg2: memref<48x624xf32, #tpu.memory_space<vmem>>, %arg3: memref<1x624xf32, #tpu.memory_space<vmem>>, %arg4: memref<1x624xf32, #tpu.memory_space<vmem>>, %arg5: memref<8x624xf32, #tpu.memory_space<vmem>>) attributes {dimension_semantics = [#tpu.dimension_semantics<parallel>], iteration_bounds = array<i64: 1>, scalar_prefetch = 0 : i64, scratch_operands = 0 : i64, tpu.core_type = #tpu.core_type<tc>, window_params = [{transform_indices = @transform_0, window_bounds = array<i64: 8, 48>}, {pipeline_mode = #tpu.pipeline_mode<synchronous>, transform_indices = @transform_1, window_bounds = array<i64: 48, 624>}, {pipeline_mode = #tpu.pipeline_mode<synchronous>, transform_indices = @transform_2, window_bounds = array<i64: 1, 624>}, {pipeline_mode = #tpu.pipeline_mode<synchronous>, transform_indices = @transform_3, window_bounds = array<i64: 1, 624>}, {transform_indices = @transform_4, window_bounds = array<i64: 8, 624>}]} {
    %c0 = arith.constant 0 : index
    %c0_0 = arith.constant 0 : index
    %0 = vector.load %arg1[%c0, %c0_0] : memref<8x48xf32, #tpu.memory_space<vmem>>, vector<8x48xf32>
    %c0_1 = arith.constant 0 : index
    %c0_2 = arith.constant 0 : index
    %1 = vector.load %arg2[%c0_1, %c0_2] : memref<48x624xf32, #tpu.memory_space<vmem>>, vector<48x624xf32>
    %cst = arith.constant dense<0.000000e+00> : vector<8x624xf32>
    %2 = tpu.matmul %0, %1, %cst {dimension_numbers = #tpu.dot_dimension_numbers<[1], [0], [0], [1], [0, 0, 1, 1], [], []>, precision = #tpu.contract_precision<fp32>} : vector<8x48xf32>, vector<48x624xf32>, vector<8x624xf32> -> vector<8x624xf32>
    %c0_3 = arith.constant 0 : index
    %c0_4 = arith.constant 0 : index
    %3 = vector.load %arg3[%c0_3, %c0_4] : memref<1x624xf32, #tpu.memory_space<vmem>>, vector<1x624xf32>
    %4 = vector.shape_cast %3 : vector<1x624xf32> to vector<1x624xf32>
    %5 = vector.broadcast %4 : vector<1x624xf32> to vector<8x624xf32>
    %6 = arith.addf %2, %5 : vector<8x624xf32>
    %7 = math.sin %6 : vector<8x624xf32>
    %c0_5 = arith.constant 0 : index
    %c0_6 = arith.constant 0 : index
    %8 = vector.load %arg4[%c0_5, %c0_6] : memref<1x624xf32, #tpu.memory_space<vmem>>, vector<1x624xf32>
    %9 = vector.shape_cast %8 : vector<1x624xf32> to vector<1x624xf32>
    %10 = vector.broadcast %9 : vector<1x624xf32> to vector<8x624xf32>
    %cst_7 = arith.constant 5.000000e-01 : f32
    %11 = vector.broadcast %cst_7 : f32 to vector<8x624xf32>
    %12 = arith.cmpf ogt, %10, %11 : vector<8x624xf32>
    %13 = arith.select %12, %2, %7 : vector<8x624xi1>, vector<8x624xf32>
    %c0_8 = arith.constant 0 : index
    %c0_9 = arith.constant 0 : index
    %14 = vector.load %arg5[%c0_8, %c0_9] : memref<8x624xf32, #tpu.memory_space<vmem>>, vector<8x624xf32>
    tpu.vector_store %arg5[%c0_8, %c0_9], %13 {strides = array<i32>} : memref<8x624xf32, #tpu.memory_space<vmem>>, vector<8x624xf32>,
    return
  }
  func.func @transform_0(%arg0: i32) -> (i32, i32) {
    %c0_i32 = arith.constant 0 : i32
    %c0_i32_0 = arith.constant 0 : i32
    return %arg0, %c0_i32 : i32, i32
  }
  func.func @transform_1(%arg0: i32) -> (i32, i32) {
    %c0_i32 = arith.constant 0 : i32
    %c0_i32_0 = arith.constant 0 : i32
    %c0_i32_1 = arith.constant 0 : i32
    return %c0_i32, %c0_i32_0 : i32, i32
  }
  func.func @transform_2(%arg0: i32) -> (i32, i32) {
    %c0_i32 = arith.constant 0 : i32
    %c0_i32_0 = arith.constant 0 : i32
    %c0_i32_1 = arith.constant 0 : i32
    return %c0_i32, %c0_i32_0 : i32, i32
  }
  func.func @transform_3(%arg0: i32) -> (i32, i32) {
    %c0_i32 = arith.constant 0 : i32
    %c0_i32_0 = arith.constant 0 : i32
    %c0_i32_1 = arith.constant 0 : i32
    return %c0_i32, %c0_i32_0 : i32, i32
  }
  func.func @transform_4(%arg0: i32) -> (i32, i32) {
    %c0_i32 = arith.constant 0 : i32
    %c0_i32_0 = arith.constant 0 : i32
    return %arg0, %c0_i32 : i32, i32
  }
}

</mosaic_0001>

<bundles_post_ra>
// kernel: apply.1
= control target key start
LH: loop header
LB: loop body
LE: loop exit
PB: predicated region body
PF: predicated region fallthrough
CT: control target
= control target key end

     0   :  { %v2552_v3 = vmov 0.0   ;;  %vm48_vm0 = vcmask 392192   ;;  %vm2553_vm1 = vmmov 0   ;;  %s3680_s1 = inlined_call_operand.vmem [shape: f32[48,624], index: 1, kind: input, shape index: {}]   ;;  %s3681_s0 = inlined_call_operand.vmem [shape: f32[8,48], index: 0, kind: input, shape index: {}]   ;;  %s3682_s2 = inlined_call_operand.vmem [shape: f32[1,624], index: 2, kind: input, shape index: {}]   ;;  %s3683_s3 = inlined_call_operand.vmem [shape: f32[1,624], index: 3, kind: input, shape index: {}]   ;;  %s3684_s4 = inlined_call_operand.vmem [shape: f32[8,624], index: 4, kind: output, shape index: {}]  }
   0x1   :  { %v44_v0 = vld [vmem:[%s3680_s1 + $0xd0] sm:$0xff]  ;;  %v43_v1 = vld [vmem:[%s3680_s1 + $0xc8] sm:$0xff]  ;;  %128 = vmatprep.mubr.f32.mxu0 %v2552_v3  ;;  %264 = vmatprep.mubr.f32.mxu1 %v2552_v3  ;;  %v38_v7 = vld [vmem:[%s3680_s1 + $0xa0] sm:$0xff] }
   0x2   :  { %v39_v2 = vld [vmem:[%s3680_s1 + $0xa8] sm:$0xff]  ;;  %v2596_v4 = vand.u32 4294901760, %v44_v0  ;;  %v2598_v5 = vand.u32 4294901760, %v43_v1  ;;  %v34_v8 = vld [vmem:[%s3680_s1 + $0x80] sm:$0xff]  ;;  %v33_v9 = vld [vmem:[%s3680_s1 + $0x78] sm:$0xff]  ;;  %v2611_v10 = vand.u32 4294901760, %v38_v7 }
   0x3   :  { %v2600_v6 = vand.u32 4294901760, %v39_v2  ;;  %v2613_v11 = vand.u32 4294901760, %v34_v8  ;;  %v2615_v12 = vand.u32 4294901760, %v33_v9  ;;  %v29_v13 = vld [vmem:[%s3680_s1 + $0x58] sm:$0xff]  ;;  %v28_v14 = vld [vmem:[%s3680_s1 + $0x50] sm:$0xff]  ;;  %v23_v20 = vld [vmem:[%s3680_s1 + $0x28] sm:$0xff] }
   0x4   :  { %v24_v15 = vld [vmem:[%s3680_s1 + $0x30] sm:$0xff]  ;;  %73 = vmatprep.subr.mxu0 %v2596_v4  ;;  %v2627_v16 = vand.u32 4294901760, %v29_v13  ;;  %v2629_v17 = vand.u32 4294901760, %v28_v14  ;;  %v2634_v19 = vsub.f32 %v44_v0, %v2596_v4  ;;  %v19_v21 = vld [vmem:[%s3680_s1 + $0x8] sm:$0xff]  ;;  %v18_v22 = vld [vmem:[%s3680_s1] sm:$0xff]  ;;  %v2646_v23 = vand.u32 4294901760, %v23_v20 }
   0x5   :  { %v2631_v18 = vand.u32 4294901760, %v24_v15  ;;  %75 = vmatpush1.msra.mxu0 %v2598_v5  ;;  %v2649_v24 = vsub.f32 %v43_v1, %v2598_v5  ;;  %v2651_v25 = vand.u32 4294901760, %v19_v21  ;;  %v2654_v26 = vsub.f32 %v39_v2, %v2600_v6  ;;  %v17_v27 = vld [vmem:[%s3681_s0] sm:$0xff] }
   0x6   :  { %77 = vmatprep.subr.mxu0 %v2600_v6  ;;  %v162_v28 = vand.u32 4294901760, %v2634_v19  ;;  %v2661_v29 = vand.u32 4294901760, %v18_v22  ;;  %v2664_v30 = vsub.f32 %v38_v7, %v2611_v10  ;;  %v2667_v31 = vsub.f32 %v34_v8, %v2613_v11 }
   0x7   :  { %79 = vmatpush1.msra.mxu0 %v2611_v10  ;;  %v168_v32 = vand.u32 4294901760, %v2649_v24  ;;  %v174_v33 = vand.u32 4294901760, %v2654_v26  ;;  %v50_v34 = vsel %vm48_vm0, %v17_v27, 0  ;;  %v2674_v35 = vsub.f32 %v33_v9, %v2615_v12 }
   0x8   :  { %81 = vmatprep.subr.mxu0 %v2613_v11  ;;  %v163_v36 = vsub.f32 %v2634_v19, %v162_v28  ;;  %v180_v37 = vand.u32 4294901760, %v2664_v30  ;;  %v186_v38 = vand.u32 4294901760, %v2667_v31  ;;  %v2682_v39 = vand.u32 4294901760, %v50_v34 }
   0x9   :  { %83 = vmatpush1.msra.mxu0 %v2615_v12  ;;  %v169_v40 = vsub.f32 %v2649_v24, %v168_v32  ;;  %v175_v41 = vsub.f32 %v2654_v26, %v174_v33  ;;  %v192_v42 = vand.u32 4294901760, %v2674_v35  ;;  %v2693_v43 = vsub.f32 %v29_v13, %v2627_v16 }
   0xa   :  { %85 = vmatprep.subr.mxu0 %v2627_v16  ;;  %v164_v44 = vand.u32 4294901760, %v163_v36  ;;  %v181_v45 = vsub.f32 %v2664_v30, %v180_v37  ;;  %v187_v46 = vsub.f32 %v2667_v31, %v186_v38  ;;  %v2703_v47 = vsub.f32 %v50_v34, %v2682_v39 }
   0xb   :  { %87 = vmatpush1.msra.mxu0 %v2629_v17  ;;  %v170_v48 = vand.u32 4294901760, %v169_v40  ;;  %v176_v49 = vand.u32 4294901760, %v175_v41  ;;  %v193_v50 = vsub.f32 %v2674_v35, %v192_v42  ;;  %v198_v51 = vand.u32 4294901760, %v2693_v43  ;;  %v46_v41 = vld [vmem:[%s3680_s1 + $0xe0] sm:$0xff] }
   0xc   :  { %89 = vmatprep.subr.mxu0 %v2631_v18  ;;  %165 = vmatprep.subr.mxu1 %v164_v44  ;;  %v182_v52 = vand.u32 4294901760, %v181_v45  ;;  %v188_v53 = vand.u32 4294901760, %v187_v46  ;;  %v2712_v54 = vand.u32 4294901760, %v2703_v47  ;;  %v2715_v55 = vsub.f32 %v28_v14, %v2629_v17  ;;  %v45_v44 = vld [vmem:[%s3680_s1 + $0xd8] sm:$0xff]  ;;  %v26_v46 = vld [vmem:[%s3680_s1 + $0x40] sm:$0xff] }
   0xd   :  { %91 = vmatpush1.msra.mxu0 %v2646_v23  ;;  %171 = vmatpush1.msra.mxu1 %v170_v48  ;;  %v194_v56 = vand.u32 4294901760, %v193_v50  ;;  %v199_v57 = vsub.f32 %v2693_v43, %v198_v51  ;;  %v2722_v58 = vsub.f32 %v24_v15, %v2631_v18  ;;  %v2725_v59 = vsub.f32 %v23_v20, %v2646_v23 }
   0xe   :  { %93 = vmatprep.subr.mxu0 %v2651_v25  ;;  %177 = vmatprep.subr.mxu1 %v176_v49  ;;  %v132_v60 = vsub.f32 %v2703_v47, %v2712_v54  ;;  %v204_v61 = vand.u32 4294901760, %v2715_v55  ;;  %v2732_v62 = vsub.f32 %v19_v21, %v2651_v25  ;;  %v2735_v63 = vsub.f32 %v18_v22, %v2661_v29  ;;  %v25_v49 = vld [vmem:[%s3680_s1 + $0x38] sm:$0xff] }
   0xf   :  { %95 = vmatpush1.msra.mxu0 %v2661_v29  ;;  %183 = vmatpush1.msra.mxu1 %v182_v52  ;;  %v200_v0 = vand.u32 4294901760, %v199_v57  ;;  %v210_v1 = vand.u32 4294901760, %v2722_v58  ;;  %v216_v2 = vand.u32 4294901760, %v2725_v59  ;;  %v21_v52 = vld [vmem:[%s3680_s1 + $0x18] sm:$0xff]  ;;  %v2891_v57 = vand.u32 4294901760, %v25_v49 }
  0x10   :  { %189 = vmatprep.subr.mxu1 %v188_v53  ;;  %294 = vmatprep.subr.mxu0 %v2634_v19  ;;  %v2741_v7 = vand.u32 4294901760, %v132_v60  ;;  %v205_v8 = vsub.f32 %v2715_v55, %v204_v61  ;;  %v222_v9 = vand.u32 4294901760, %v2732_v62  ;;  %v228_v13 = vand.u32 4294901760, %v2735_v63  ;;  %v41_v19 = vld [vmem:[%s3680_s1 + $0xb8] sm:$0xff] }
  0x11   :  { %195 = vmatpush1.msra.mxu1 %v194_v56  ;;  %v211_v14 = vsub.f32 %v2722_v58, %v210_v1  ;;  %v217_v15 = vsub.f32 %v2725_v59, %v216_v2  ;;  %v2877_v53 = vand.u32 4294901760, %v26_v46 }
  0x12   :  { %134 = vmatmul.mubr.f32.vlgmr.msra.gmra.mxu0 %v2741_v7  ;;  %201 = vmatprep.subr.mxu1 %v200_v0  ;;  %v206_v20 = vand.u32 4294901760, %v205_v8  ;;  %v223_v21 = vsub.f32 %v2732_v62, %v222_v9  ;;  %v229_v22 = vsub.f32 %v2735_v63, %v228_v13 }
  0x13   :  { %297 = vmatpush1.msra.mxu0 %v2649_v24  ;;  %v212_v27 = vand.u32 4294901760, %v211_v14  ;;  %v218_v34 = vand.u32 4294901760, %v217_v15  ;;  %360 = vmatprep.mubr.f32.mxu0 %v2552_v3  ;;  %v2801_v24 = vand.u32 4294901760, %v46_v41 }
  0x14   :  { %300 = vmatprep.subr.mxu0 %v2654_v26  ;;  %207 = vmatpush1.msra.mxu1 %v206_v20  ;;  %v224_v36 = vand.u32 4294901760, %v223_v21  ;;  %v230_v40 = vand.u32 4294901760, %v229_v22  ;;  %v2809_v26 = vand.u32 4294901760, %v45_v44 }
  0x15   :  { %303 = vmatpush1.msra.mxu0 %v2664_v30  ;;  %213 = vmatprep.subr.mxu1 %v212_v27  ;;  %v36_v30 = vld [vmem:[%s3680_s1 + $0x90] sm:$0xff] }
  0x16   :  { %306 = vmatprep.subr.mxu0 %v2667_v31  ;;  %219 = vmatpush1.msra.mxu1 %v218_v34  ;;  %v35_v31 = vld [vmem:[%s3680_s1 + $0x88] sm:$0xff] }
  0x17   :  { %309 = vmatpush1.msra.mxu0 %v2674_v35  ;;  %225 = vmatprep.subr.mxu1 %v224_v36  ;;  %v31_v35 = vld [vmem:[%s3680_s1 + $0x68] sm:$0xff]  ;;  %v2847_v45 = vand.u32 4294901760, %v35_v31 }
  0x18   :  { %312 = vmatprep.subr.mxu0 %v2693_v43  ;;  %231 = vmatpush1.msra.mxu1 %v230_v40  ;;  %v2845_v43 = vsub.f32 %v45_v44, %v2809_v26  ;;  %v2855_v48 = vand.u32 4294901760, %v31_v35 }
  0x19   :  { %315 = vmatpush1.msra.mxu0 %v2715_v55  ;;  %266 = vmatmul.mubr.f32.vlgmr.msra.gmra.mxu1 %v2682_v39  ;;  %v20_v55 = vld [vmem:[%s3680_s1 + $0x10] sm:$0xff] }
  0x1a   :  { %318 = vmatprep.subr.mxu0 %v2722_v58  ;;  %390 = vmatprep.subr.mxu1 %v2596_v4  ;;  %v763_v58 = vand.u32 4294901760, %v2845_v43 }
  0x1b   :  { %321 = vmatpush1.msra.mxu0 %v2725_v59  ;;  %392 = vmatpush1.msra.mxu1 %v2598_v5  ;;  %v2896_v59 = vand.u32 4294901760, %v21_v52 }
  0x1c   :  { %324 = vmatprep.subr.mxu0 %v2732_v62  ;;  %394 = vmatprep.subr.mxu1 %v2600_v6  ;;  %v2907_v62 = vand.u32 4294901760, %v20_v55 }
  0x1d   :  { %327 = vmatpush1.msra.mxu0 %v2735_v63  ;;  %396 = vmatpush1.msra.mxu1 %v2611_v10 }
  0x1e   :  { %363 = vmatmul.mubr.f32.vlgmr.msra.gmra.mxu0 %v2703_v47  ;;  %398 = vmatprep.subr.mxu1 %v2613_v11 }
  0x1f   :  { %478 = vmatprep.subr.mxu0 %v162_v28  ;;  %400 = vmatpush1.msra.mxu1 %v2615_v12  ;;  %v40_v28 = vld [vmem:[%s3680_s1 + $0xb0] sm:$0xff] }
  0x20   :  { %482 = vmatpush1.msra.mxu0 %v168_v32  ;;  %402 = vmatprep.subr.mxu1 %v2627_v16  ;;  %v2817_v32 = vand.u32 4294901760, %v41_v19 }
  0x21   :  { %486 = vmatprep.subr.mxu0 %v174_v33  ;;  %404 = vmatpush1.msra.mxu1 %v2629_v17  ;;  %v2825_v33 = vand.u32 4294901760, %v40_v28 }
  0x22   :  { %490 = vmatpush1.msra.mxu0 %v180_v37  ;;  %406 = vmatprep.subr.mxu1 %v2631_v18  ;;  %v2833_v37 = vand.u32 4294901760, %v36_v30  ;;  %v2861_v50 = vsub.f32 %v41_v19, %v2817_v32 }
  0x23   :  { %494 = vmatprep.subr.mxu0 %v186_v38  ;;  %408 = vmatpush1.msra.mxu1 %v2646_v23  ;;  %v30_v38 = vld [vmem:[%s3680_s1 + $0x60] sm:$0xff] }
  0x24   :  { %498 = vmatpush1.msra.mxu0 %v192_v42  ;;  %410 = vmatprep.subr.mxu1 %v2651_v25  ;;  %v2839_v42 = vsub.f32 %v46_v41, %v2801_v24  ;;  %v2884_v56 = vsub.f32 %v36_v30, %v2833_v37  ;;  %v769_v60 = vand.u32 4294901760, %v2861_v50 }
  0x25   :  { %502 = vmatprep.subr.mxu0 %v198_v51  ;;  %412 = vmatpush1.msra.mxu1 %v2661_v29  ;;  %v2867_v51 = vsub.f32 %v40_v28, %v2825_v33 }
  0x26   :  { %445 = vmatprep.mubr.f32.mxu1 %v2552_v3  ;;  %506 = vmatpush1.msra.mxu0 %v204_v61  ;;  %v2900_v61 = vsub.f32 %v31_v35, %v2855_v48  ;;  %v781_v0 = vand.u32 4294901760, %v2884_v56  ;;  %v770_v8 = vsub.f32 %v2861_v50, %v769_v60 }
  0x27   :  { %449 = vmatmul.mubr.f32.vlgmr.msra.gmra.mxu1 %v2712_v54  ;;  %510 = vmatprep.subr.mxu0 %v210_v1  ;;  %v775_v63 = vand.u32 4294901760, %v2867_v51  ;;  %v2917_v1 = vsub.f32 %v26_v46, %v2877_v53 }
  0x28   :  { %584 = vmatprep.subr.mxu1 %v2596_v4  ;;  %514 = vmatpush1.msra.mxu0 %v216_v2  ;;  %v2869_v4 = vand.u32 4294901760, %v30_v38  ;;  %v782_v20 = vsub.f32 %v2884_v56, %v781_v0 }
  0x29   :  { %586 = vmatpush1.msra.mxu1 %v2598_v5  ;;  %518 = vmatprep.subr.mxu0 %v222_v9  ;;  %v757_v5 = vand.u32 4294901760, %v2839_v42  ;;  %v793_v9 = vand.u32 4294901760, %v2900_v61 }
  0x2a   :  { %588 = vmatprep.subr.mxu1 %v2600_v6  ;;  %522 = vmatpush1.msra.mxu0 %v228_v13  ;;  %v2889_v6 = vsub.f32 %v35_v31, %v2847_v45  ;;  %v2940_v13 = vsub.f32 %v20_v55, %v2907_v62  ;;  %v783_v44 = vand.u32 4294901760, %v782_v20  ;;  %v1755_v20 = vlaneseq }
  0x2b   :  { %555 = vmatprep.mubr.f32.mxu0 %v2552_v3  ;;  %590 = vmatpush1.msra.mxu1 %v2611_v10  ;;  %v2905_v10 = vsub.f32 %v30_v38, %v2869_v4  ;;  %v794_v34 = vsub.f32 %v2900_v61, %v793_v9 }
  0x2c   :  { %557 = vmatmul.mubr.f32.vlgmr.msra.gmra.mxu0 %v2682_v39  ;;  %592 = vmatprep.subr.mxu1 %v2613_v11  ;;  %v758_v11 = vsub.f32 %v2839_v42, %v757_v5  ;;  %v787_v2 = vand.u32 4294901760, %v2889_v6  ;;  %v823_v41 = vand.u32 4294901760, %v2940_v13 }
  0x2d   :  { %668 = vmatprep.subr.mxu0 %v2801_v24  ;;  %594 = vmatpush1.msra.mxu1 %v2615_v12  ;;  %v2922_v12 = vsub.f32 %v25_v49, %v2891_v57  ;;  %v799_v14 = vand.u32 4294901760, %v2905_v10  ;;  %v795_v31 = vand.u32 4294901760, %v794_v34 }
  0x2e   :  { %670 = vmatpush1.msra.mxu0 %v2809_v26  ;;  %596 = vmatprep.subr.mxu1 %v2627_v16  ;;  %v764_v16 = vsub.f32 %v2845_v43, %v763_v58  ;;  %v759_v15 = vand.u32 4294901760, %v758_v11  ;;  %v788_v22 = vsub.f32 %v2889_v6, %v787_v2  ;;  %v824_v46 = vsub.f32 %v2940_v13, %v823_v41 }
  0x2f   :  { %672 = vmatprep.subr.mxu0 %v2817_v32  ;;  %598 = vmatpush1.msra.mxu1 %v2629_v17  ;;  %v2935_v17 = vsub.f32 %v21_v52, %v2896_v59  ;;  %v811_v27 = vand.u32 4294901760, %v2922_v12  ;;  %v800_v40 = vsub.f32 %v2905_v10, %v799_v14 }
  0x30   :  { %674 = vmatpush1.msra.mxu0 %v2825_v33  ;;  %600 = vmatprep.subr.mxu1 %v2631_v18  ;;  %v776_v18 = vsub.f32 %v2867_v51, %v775_v63  ;;  %v765_v21 = vand.u32 4294901760, %v764_v16  ;;  %v789_v28 = vand.u32 4294901760, %v788_v22  ;;  %v825_v11 = vand.u32 4294901760, %v824_v46  ;;  %v47_v16 = vld [vmem:[%s3680_s1 + $0xe8] sm:$0xff] }
  0x31   :  { %676 = vmatprep.subr.mxu0 %v2833_v37  ;;  %602 = vmatpush1.msra.mxu1 %v2646_v23  ;;  %v805_v23 = vand.u32 4294901760, %v2917_v1  ;;  %v817_v36 = vand.u32 4294901760, %v2935_v17  ;;  %v812_v30 = vsub.f32 %v2922_v12, %v811_v27  ;;  %v801_v38 = vand.u32 4294901760, %v800_v40 }
  0x32   :  { %678 = vmatpush1.msra.mxu0 %v2847_v45  ;;  %604 = vmatprep.subr.mxu1 %v2651_v25  ;;  %v771_v25 = vand.u32 4294901760, %v770_v8  ;;  %v3219_v22 = vshrl.u32 %v1755_v20, 7 }
  0x33   :  { %680 = vmatprep.subr.mxu0 %v2855_v48  ;;  %606 = vmatpush1.msra.mxu1 %v2661_v29  ;;  %v777_v29 = vand.u32 4294901760, %v776_v18  ;;  %v806_v19 = vsub.f32 %v2917_v1, %v805_v23  ;;  %v818_v35 = vsub.f32 %v2935_v17, %v817_v36  ;;  %v813_v52 = vand.u32 4294901760, %v812_v30 }
  0x34   :  { %639 = vmatprep.mubr.f32.mxu1 %v2552_v3  ;;  %682 = vmatpush1.msra.mxu0 %v2869_v4  ;;  %v1761_v30 = vsub.s32 1, %v3219_v22 }
  0x35   :  { %641 = vmatmul.mubr.f32.vlgmr.msra.gmra.mxu1 %v2682_v39  ;;  %684 = vmatprep.subr.mxu0 %v2877_v53  ;;  %v807_v49 = vand.u32 4294901760, %v806_v19  ;;  %v819_v55 = vand.u32 4294901760, %v818_v35 }
  0x36   :  { %760 = vmatprep.subr.mxu1 %v759_v15  ;;  %686 = vmatpush1.msra.mxu0 %v2891_v57 }
  0x37   :  { %766 = vmatpush1.msra.mxu1 %v765_v21  ;;  %688 = vmatprep.subr.mxu0 %v2896_v59 }
  0x38   :  { %772 = vmatprep.subr.mxu1 %v771_v25  ;;  %690 = vmatpush1.msra.mxu0 %v2907_v62 }
  0x39   :  { %778 = vmatpush1.msra.mxu1 %v777_v29  ;;  %723 = vmatprep.mubr.f32.mxu0 %v2552_v3 }
  0x3a   :  { %784 = vmatprep.subr.mxu1 %v783_v44  ;;  %889 = vmatprep.subr.mxu0 %v2839_v42  ;;  %v42_v42 = vld [vmem:[%s3680_s1 + $0xc0] sm:$0xff] }
  0x3b   :  { %729 = vmatmul.mubr.f32.vlgmr.msra.gmra.mxu0 %v2741_v7  ;;  %790 = vmatpush1.msra.mxu1 %v789_v28 }
  0x3c   :  { %892 = vmatpush1.msra.mxu0 %v2845_v43  ;;  %796 = vmatprep.subr.mxu1 %v795_v31  ;;  %v3029_v43 = vand.u32 4294901760, %v47_v16 }
  0x3d   :  { %895 = vmatprep.subr.mxu0 %v2861_v50  ;;  %802 = vmatpush1.msra.mxu1 %v801_v38  ;;  %v37_v50 = vld [vmem:[%s3680_s1 + $0x98] sm:$0xff] }
  0x3e   :  { %898 = vmatpush1.msra.mxu0 %v2867_v51  ;;  %808 = vmatprep.subr.mxu1 %v807_v49  ;;  %v3040_v51 = vand.u32 4294901760, %v42_v42 }
  0x3f   :  { %901 = vmatprep.subr.mxu0 %v2884_v56  ;;  %814 = vmatpush1.msra.mxu1 %v813_v52  ;;  %v3052_v56 = vsub.f32 %v47_v16, %v3029_v43 }
  0x40   :  { %904 = vmatpush1.msra.mxu0 %v2889_v6  ;;  %820 = vmatprep.subr.mxu1 %v819_v55  ;;  %v3054_v6 = vand.u32 4294901760, %v37_v50 }
  0x41   :  { %907 = vmatprep.subr.mxu0 %v2900_v61  ;;  %826 = vmatpush1.msra.mxu1 %v825_v11 }
  0x42   :  { %859 = vmatprep.mubr.f32.mxu1 %v2552_v3  ;;  %910 = vmatpush1.msra.mxu0 %v2905_v10 }
  0x43   :  { %861 = vmatmul.mubr.f32.vlgmr.msra.gmra.mxu1 %v2682_v39  ;;  %913 = vmatprep.subr.mxu0 %v2917_v1 }
  0x44   :  { %985 = vmatprep.subr.mxu1 %v2801_v24  ;;  %916 = vmatpush1.msra.mxu0 %v2922_v12 }
  0x45   :  { %987 = vmatpush1.msra.mxu1 %v2809_v26  ;;  %919 = vmatprep.subr.mxu0 %v2935_v17 }
  0x46   :  { %989 = vmatprep.subr.mxu1 %v2817_v32  ;;  %922 = vmatpush1.msra.mxu0 %v2940_v13 }
  0x47   :  { %955 = vmatprep.mubr.f32.mxu0 %v2552_v3  ;;  %991 = vmatpush1.msra.mxu1 %v2825_v33 }
  0x48   :  { %958 = vmatmul.mubr.f32.vlgmr.msra.gmra.mxu0 %v2703_v47  ;;  %993 = vmatprep.subr.mxu1 %v2833_v37 }
  0x49   :  { %1073 = vmatprep.subr.mxu0 %v757_v5  ;;  %995 = vmatpush1.msra.mxu1 %v2847_v45  ;;  %v32_v5 = vld [vmem:[%s3680_s1 + $0x70] sm:$0xff] }
  0x4a   :  { %1077 = vmatpush1.msra.mxu0 %v763_v58  ;;  %997 = vmatprep.subr.mxu1 %v2855_v48  ;;  %v27_v58 = vld [vmem:[%s3680_s1 + $0x48] sm:$0xff]  ;;  %v3068_v61 = vand.u32 4294901760, %v32_v5 }
  0x4b   :  { %1081 = vmatprep.subr.mxu0 %v769_v60  ;;  %999 = vmatpush1.msra.mxu1 %v2869_v4  ;;  %v3066_v60 = vsub.f32 %v42_v42, %v3040_v51  ;;  %v3081_v10 = vand.u32 4294901760, %v27_v58 }
  0x4c   :  { %1085 = vmatpush1.msra.mxu0 %v775_v63  ;;  %1001 = vmatprep.subr.mxu1 %v2877_v53  ;;  %v1346_v63 = vand.u32 4294901760, %v3052_v56 }
  0x4d   :  { %1089 = vmatprep.subr.mxu0 %v781_v0  ;;  %1003 = vmatpush1.msra.mxu1 %v2891_v57 }
  0x4e   :  { %1093 = vmatpush1.msra.mxu0 %v787_v2  ;;  %1005 = vmatprep.subr.mxu1 %v2896_v59 }
  0x4f   :  { %1097 = vmatprep.subr.mxu0 %v793_v9  ;;  %1007 = vmatpush1.msra.mxu1 %v2907_v62 }
  0x50   :  { %1040 = vmatprep.mubr.f32.mxu1 %v2552_v3  ;;  %1101 = vmatpush1.msra.mxu0 %v799_v14 }
  0x51   :  { %1044 = vmatmul.mubr.f32.vlgmr.msra.gmra.mxu1 %v2712_v54  ;;  %1105 = vmatprep.subr.mxu0 %v805_v23 }
  0x52   :  { %1179 = vmatprep.subr.mxu1 %v2801_v24  ;;  %1109 = vmatpush1.msra.mxu0 %v811_v27  ;;  %v22_v24 = vld [vmem:[%s3680_s1 + $0x20] sm:$0xff] }
  0x53   :  { %1181 = vmatpush1.msra.mxu1 %v2809_v26  ;;  %1113 = vmatprep.subr.mxu0 %v817_v36  ;;  %v3079_v26 = vsub.f32 %v37_v50, %v3054_v6  ;;  %v3091_v0 = vand.u32 4294901760, %v22_v24 }
  0x54   :  { %1183 = vmatprep.subr.mxu1 %v2817_v32  ;;  %1117 = vmatpush1.msra.mxu0 %v823_v41  ;;  %v3089_v32 = vsub.f32 %v32_v5, %v3068_v61 }
  0x55   :  { %1150 = vmatprep.mubr.f32.mxu0 %v2552_v3  ;;  %1185 = vmatpush1.msra.mxu1 %v2825_v33  ;;  %v1353_v33 = vand.u32 4294901760, %v3066_v60  ;;  %v1360_v1 = vand.u32 4294901760, %v3079_v26 }
  0x56   :  { %1152 = vmatmul.mubr.f32.vlgmr.msra.gmra.mxu0 %v2682_v39  ;;  %1187 = vmatprep.subr.mxu1 %v2833_v37  ;;  %v3099_v37 = vsub.f32 %v27_v58, %v3081_v10  ;;  %v1367_v12 = vand.u32 4294901760, %v3089_v32 }
  0x57   :  { %2414 = vmatprep.subr.mxu0 %v2552_v3  ;;  %1189 = vmatpush1.msra.mxu1 %v2847_v45  ;;  %v1347_v45 = vsub.f32 %v3052_v56, %v1346_v63 }
  0x58   :  { %2415 = vmatpush3.msra.mxu0 %v3029_v43  ;;  %1191 = vmatprep.subr.mxu1 %v2855_v48  ;;  %v3110_v48 = vsub.f32 %v22_v24, %v3091_v0  ;;  %v1374_v2 = vand.u32 4294901760, %v3099_v37 }
  0x59   :  { %2416 = vmatprep.subr.mxu0 %v2552_v3  ;;  %1193 = vmatpush1.msra.mxu1 %v2869_v4  ;;  %v1354_v4 = vsub.f32 %v3066_v60, %v1353_v33 }
  0x5a   :  { %2417 = vmatpush3.msra.mxu0 %v3040_v51  ;;  %1195 = vmatprep.subr.mxu1 %v2877_v53  ;;  %v1348_v53 = vand.u32 4294901760, %v1347_v45  ;;  %v1381_v8 = vand.u32 4294901760, %v3110_v48  ;;  %v1375_v17 = vsub.f32 %v3099_v37, %v1374_v2 }
  0x5b   :  { %2418 = vmatprep.subr.mxu0 %v2552_v3  ;;  %1197 = vmatpush1.msra.mxu1 %v2891_v57  ;;  %v1361_v57 = vsub.f32 %v3079_v26, %v1360_v1 }
  0x5c   :  { %2419 = vmatpush3.msra.mxu0 %v3054_v6  ;;  %1199 = vmatprep.subr.mxu1 %v2896_v59  ;;  %v1355_v59 = vand.u32 4294901760, %v1354_v4  ;;  %v1382_v18 = vsub.f32 %v3110_v48, %v1381_v8  ;;  %v1376_v14 = vand.u32 4294901760, %v1375_v17  ;;  %v2554_v4 = vmov 683565275  }
  0x5d   :  { %2420 = vmatprep.subr.mxu0 %v2552_v3  ;;  %1201 = vmatpush1.msra.mxu1 %v2907_v62  ;;  %v1368_v62 = vsub.f32 %v3089_v32, %v1367_v12  ;;  %v1362_v9 = vand.u32 4294901760, %v1361_v57  ;;  %v2555_v57 = vmov 2475754826   ;;  %v2558_v17 = vmov 920167782  }
  0x5e   :  { %1234 = vmatprep.mubr.f32.mxu1 %v2552_v3  ;;  %2421 = vmatpush3.msra.mxu0 %v3068_v61  ;;  %v1383_v15 = vand.u32 4294901760, %v1382_v18 }
  0x5f   :  { %1236 = vmatmul.mubr.f32.vlgmr.msra.gmra.mxu1 %v2682_v39  ;;  %2422 = vmatprep.subr.mxu0 %v2552_v3  ;;  %v1369_v13 = vand.u32 4294901760, %v1368_v62 }
  0x60   :  { %2429 = vmatprep.subr.mxu1 %v2552_v3  ;;  %2423 = vmatpush3.msra.mxu0 %v3081_v10 }
  0x61   :  { %2430 = vmatpush3.msra.mxu1 %v1348_v53  ;;  %2424 = vmatprep.subr.mxu0 %v2552_v3 }
  0x62   :  { %2431 = vmatprep.subr.mxu1 %v2552_v3  ;;  %2425 = vmatpush3.msra.mxu0 %v3091_v0 }
  0x63   :  { %2432 = vmatpush3.msra.mxu1 %v1355_v59  ;;  %2426 = vmatprep.mubr.msk.f32.mxu0 %vm2553_vm1, %v2552_v3  ;;  %v2556_v59 = vmov 2131351028  }
  0x64   :  { %2433 = vmatprep.subr.mxu1 %v2552_v3  ;;  %2444 = vmatprep.subr.mxu0 %v2552_v3 }
  0x65   :  { %2427 = vmatmul.mubr.f32.vlgmr.msra.gmra.mxu0 %v2741_v7  ;;  %2434 = vmatpush3.msra.mxu1 %v1362_v9 }
  0x66   :  { %2445 = vmatpush3.msra.mxu0 %v3052_v56  ;;  %2435 = vmatprep.subr.mxu1 %v2552_v3 }
  0x67   :  { %2446 = vmatprep.subr.mxu0 %v2552_v3  ;;  %2436 = vmatpush3.msra.mxu1 %v1369_v13 }
  0x68   :  { %2447 = vmatpush3.msra.mxu0 %v3066_v60  ;;  %2437 = vmatprep.subr.mxu1 %v2552_v3 }
  0x69   :  { %2448 = vmatprep.subr.mxu0 %v2552_v3  ;;  %2438 = vmatpush3.msra.mxu1 %v1376_v14 }
  0x6a   :  { %2449 = vmatpush3.msra.mxu0 %v3079_v26  ;;  %2439 = vmatprep.subr.mxu1 %v2552_v3 }
  0x6b   :  { %2450 = vmatprep.subr.mxu0 %v2552_v3  ;;  %2440 = vmatpush3.msra.mxu1 %v1383_v15 }
  0x6c   :  { %2441 = vmatprep.mubr.msk.f32.mxu1 %vm2553_vm1, %v2552_v3  ;;  %2451 = vmatpush3.msra.mxu0 %v3089_v32 }
  0x6d   :  { %2442 = vmatmul.mubr.f32.vlgmr.msra.gmra.mxu1 %v2682_v39  ;;  %2452 = vmatprep.subr.mxu0 %v2552_v3 }
  0x6e   :  { %2459 = vmatprep.subr.mxu1 %v2552_v3  ;;  %2453 = vmatpush3.msra.mxu0 %v3099_v37 }
  0x6f   :  { %2460 = vmatpush3.msra.mxu1 %v3029_v43  ;;  %2454 = vmatprep.subr.mxu0 %v2552_v3 }
  0x70   :  { %2461 = vmatprep.subr.mxu1 %v2552_v3  ;;  %2455 = vmatpush3.msra.mxu0 %v3110_v48 }
  0x71   :  { %2456 = vmatprep.mubr.msk.f32.mxu0 %vm2553_vm1, %v2552_v3  ;;  %2462 = vmatpush3.msra.mxu1 %v3040_v51 }
  0x72   :  { %2457 = vmatmul.mubr.f32.vlgmr.msra.gmra.mxu0 %v2703_v47  ;;  %2463 = vmatprep.subr.mxu1 %v2552_v3 }
  0x73   :  { %2474 = vmatprep.subr.mxu0 %v2552_v3  ;;  %2464 = vmatpush3.msra.mxu1 %v3054_v6 }
  0x74   :  { %2475 = vmatpush3.msra.mxu0 %v1346_v63  ;;  %2465 = vmatprep.subr.mxu1 %v2552_v3 }
  0x75   :  { %2476 = vmatprep.subr.mxu0 %v2552_v3  ;;  %2466 = vmatpush3.msra.mxu1 %v3068_v61 }
  0x76   :  { %2477 = vmatpush3.msra.mxu0 %v1353_v33  ;;  %2467 = vmatprep.subr.mxu1 %v2552_v3 }
  0x77   :  { %2478 = vmatprep.subr.mxu0 %v2552_v3  ;;  %2468 = vmatpush3.msra.mxu1 %v3081_v10 }
  0x78   :  { %2479 = vmatpush3.msra.mxu0 %v1360_v1  ;;  %2469 = vmatprep.subr.mxu1 %v2552_v3 }
  0x79   :  { %2480 = vmatprep.subr.mxu0 %v2552_v3  ;;  %2470 = vmatpush3.msra.mxu1 %v3091_v0 }
  0x7a   :  { %2471 = vmatprep.mubr.msk.f32.mxu1 %vm2553_vm1, %v2552_v3  ;;  %2481 = vmatpush3.msra.mxu0 %v1367_v12 }
  0x7b   :  { %2472 = vmatmul.mubr.f32.vlgmr.msra.gmra.mxu1 %v2712_v54  ;;  %2482 = vmatprep.subr.mxu0 %v2552_v3 }
  0x7c   :  { %2489 = vmatprep.subr.mxu1 %v2552_v3  ;;  %2483 = vmatpush3.msra.mxu0 %v1374_v2 }
  0x7d   :  { %2490 = vmatpush3.msra.mxu1 %v3029_v43  ;;  %2484 = vmatprep.subr.mxu0 %v2552_v3 }
  0x7e   :  { %2491 = vmatprep.subr.mxu1 %v2552_v3  ;;  %2485 = vmatpush3.msra.mxu0 %v1381_v8  ;;  %v2557_v8 = vmov 2102212464  }
  0x7f   :  { %2486 = vmatprep.mubr.msk.f32.mxu0 %vm2553_vm1, %v2552_v3  ;;  %2492 = vmatpush3.msra.mxu1 %v3040_v51 }
  0x80   :  { %2487 = vmatmul.mubr.f32.vlgmr.msra.gmra.mxu0 %v2682_v39  ;;  %2493 = vmatprep.subr.mxu1 %v2552_v3 }
  0x81   :  { %2494 = vmatpush3.msra.mxu1 %v3054_v6  ;;  %2501 = vmatprep.mubr.msk.f32.mxu1 %vm2553_vm1, %v2552_v3 }
  0x82   :  { %2495 = vmatprep.subr.mxu1 %v2552_v3 }
  0x83   :  { %2496 = vmatpush3.msra.mxu1 %v3068_v61 }
  0x84   :  { %2497 = vmatprep.subr.mxu1 %v2552_v3 }
  0x85   :  { %2498 = vmatpush3.msra.mxu1 %v3081_v10 }
  0x86   :  { %2499 = vmatprep.subr.mxu1 %v2552_v3  ;;  %v1757_v3 = vsub.s32 0, %v3219_v22 }
  0x87   :  { %2500 = vmatpush3.msra.mxu1 %v3091_v0 }
  0x88   :  { %2502 = vmatmul.mubr.f32.vlgmr.msra.gmra.mxu1 %v2682_v39  ;;  %v3225_v39 = vld [vmem:[%s3682_s2] sm:$0x1f] }
  0x89   :  { %v1758_v38 = vrot.slane %v3225_v39, %v1757_v3  ;;  %v1762_v11 = vrot.slane %v3225_v39, %v1761_v30 }
  0xd2   :  { %v135_v47 = vpop.f32.mrf.mxu0 }
  0xd4   :  { %v137_v54 = vpop.f32.mrf.mxu0 }
  0xd9   :  { %v267_v7 = vpop.f32.mrf.mxu1 }
  0xda   :  { %v268_v34 = vadd.f32 %v267_v7, %v135_v47  ;;  %v2559_v7 = vmov 1326507024  }
  0xdb   :  { %v269_v21 = vpop.f32.mrf.mxu1 }
  0xdc   :  { %v270_v29 = vadd.f32 %v269_v21, %v137_v54 }
  0xde   :  { %v364_v23 = vpop.f32.mrf.mxu0 }
  0xdf   :  { %v365_v40 = vadd.f32 %v364_v23, %v268_v34 }
  0xe0   :  { %v366_v27 = vpop.f32.mrf.mxu0 }
  0xe1   :  { %v367_v44 = vadd.f32 %v366_v27, %v270_v29 }
  0xe7   :  { %v450_v25 = vpop.f32.mrf.mxu1 }
  0xe8   :  { %v451_v19 = vadd.f32 %v450_v25, %v365_v40 }
  0xe9   :  { %v452_v41 = vpop.f32.mrf.mxu1 }
  0xea   :  { %v453_v31 = vadd.f32 %v452_v41, %v367_v44 }
  0xec   :  { %v558_v36 = vpop.f32.mrf.mxu0 }
  0xed   :  { %v559_v35 = vadd.f32 %v558_v36, %v451_v19 }
  0xee   :  { %v560_v28 = vpop.f32.mrf.mxu0 }
  0xef   :  { %v561_v49 = vadd.f32 %v560_v28, %v453_v31 }
  0xf5   :  { %v642_v46 = vpop.f32.mrf.mxu1 }
  0xf6   :  { %v3231_v52 = vadd.f32 %v642_v46, %v559_v35 }
  0xf7   :  { %v644_v55 = vpop.f32.mrf.mxu1 }
  0xf8   :  { %v3237_v16 = vadd.f32 %v1758_v38, %v3231_v52  ;;  %v3239_v42 = vadd.f32 %v644_v55, %v561_v49 }
  0xfa   :  { %v1785_v43 = vand.u32 2147483647, %v3237_v16  ;;  %v1788_v50 = vand.u32 2139095040, %v3237_v16  ;;  %v3244_v51 = vadd.f32 %v1762_v11, %v3239_v42  ;;  %vm1787_vm14 = vcmp.lt.s32.totalorder %v3237_v16, 0 }
  0xfb   :  { %v730_v49 = vpop.f32.mrf.mxu0 }
  0xfc   :  { %v1789_v5 = vshrl.u32 %v1788_v50, 23  ;;  %v1792_v56 = vand.u32 8388607, %v1785_v43  ;;  %v1889_v6 = vand.u32 2147483647, %v3244_v51  ;;  %v1892_v58 = vand.u32 2139095040, %v3244_v51 }
  0xfd   :  { %vm3343_vm15 = vcmp.le.f32.partialorder %v1785_v43, 0.7853982  ;;  %vm1891_vm1 = vcmp.lt.s32.totalorder %v3244_v51, 0 }
  0xfe   :  { %v2352_v60 = vadd.s32 4294967169, %v1789_v5  ;;  %v1893_v61 = vshrl.u32 %v1892_v58, 23  ;;  %v1896_v24 = vand.u32 8388607, %v1889_v6  ;;  %v1793_v10 = vor.u32 8388608, %v1792_v56 }
 0x100   :  { %v1795_v26 = vadd.s32 1, %v2352_v60  ;;  %v2356_v63 = vadd.s32 4294967169, %v1893_v61  ;;  %v1897_v32 = vor.u32 8388608, %v1896_v24  ;;  %v3252_v1 = vshll.u32 %v1793_v10, 8 }
 0x102   :  { %vm1796_vm2 = vcmp.gt.s32.totalorder %v1795_v26, 0  ;;  %v1899_v33 = vadd.s32 1, %v2356_v63  ;;  %v3255_v53 = vshll.u32 %v1897_v32, 8 }
 0x103   :  { %v1797_v0 = vsel %vm1796_vm2, %v1795_v26, 0  ;;  %v862_v40 = vpop.f32.mrf.mxu1 }
 0x104   :  { %v1798_v37 = vshrl.u32 %v1797_v0, 5  ;;  %v1799_v45 = vand.u32 31, %v1797_v0  ;;  %vm1900_vm3 = vcmp.gt.s32.totalorder %v1899_v33, 0  ;;  %v863_v50 = vadd.f32 %v862_v40, %v730_v49 }
 0x105   :  { %v1901_v25 = vsel %vm1900_vm3, %v1899_v33, 0  ;;  %vm3379_vm3 = vcmp.le.f32.partialorder %v1889_v6, 0.7853982 }
 0x106   :  { %v1800_v48 = vsub.s32 32, %v1799_v45  ;;  %v1802_v12 = vshll.u32 %v2554_v4, %v1799_v45  ;;  %v1805_v2 = vshll.u32 %v2555_v57, %v1799_v45  ;;  %v1808_v62 = vshll.u32 %v2556_v59, %v1799_v45 }
 0x107   :  { %v1811_v9 = vshll.u32 %v2557_v8, %v1799_v45  ;;  %v1814_v13 = vshll.u32 %v2558_v17, %v1799_v45  ;;  %vm1817_vm4 = vcmp.lt.s32.totalorder %v1798_v37, 1  ;;  %vm1819_vm5 = vcmp.lt.s32.totalorder %v1798_v37, 3 }
 0x108   :  { %v1803_v18 = vshrl.u32 %v2555_v57, %v1800_v48  ;;  %v1806_v14 = vshrl.u32 %v2556_v59, %v1800_v48  ;;  %v1809_v15 = vshrl.u32 %v2557_v8, %v1800_v48  ;;  %v1801_v47 = vshrl.u32 %v2554_v4, %v1800_v48 }
 0x109   :  { %v1812_v54 = vshrl.u32 %v2558_v17, %v1800_v48  ;;  %v1815_v20 = vshrl.u32 %v2559_v7, %v1800_v48  ;;  %vm1820_vm6 = vcmp.lt.s32.totalorder %v1798_v37, 4  ;;  %v1903_v29 = vand.u32 31, %v1901_v25 }
 0x10a   :  { %v1804_v23 = vor.u32 %v1803_v18, %v1802_v12  ;;  %v1807_v21 = vor.u32 %v1806_v14, %v1805_v2  ;;  %v1810_v27 = vor.u32 %v1809_v15, %v1808_v62  ;;  %vm1818_vm7 = vcmp.lt.s32.totalorder %v1798_v37, 2  ;;  %v732_v37 = vpop.f32.mrf.mxu0 }
 0x10b   :  { %v1813_v34 = vor.u32 %v1812_v54, %v1811_v9  ;;  %v1816_v36 = vor.u32 %v1815_v20, %v1814_v13  ;;  %v1904_v46 = vsub.s32 32, %v1903_v29  ;;  %v1902_v60 = vshrl.u32 %v1901_v25, 5 }
 0x10c   :  { %v1821_v41 = vsel %vm1817_vm4, %v1801_v47, %v1804_v23  ;;  %v1822_v44 = vsel %vm1820_vm6, %v1810_v27, 2102212464  ;;  %v1825_v19 = vsel %vm1817_vm4, %v1804_v23, %v1807_v21  ;;  %v1829_v28 = vsel %vm1817_vm4, %v1807_v21, %v1810_v27  ;;  %v959_v14 = vpop.f32.mrf.mxu0 }
 0x10d   :  { %v1823_v31 = vsel %vm1819_vm5, %v1807_v21, %v1822_v44  ;;  %v1826_v35 = vsel %vm1820_vm6, %v1813_v34, 920167782  ;;  %v1830_v38 = vsel %vm1820_vm6, %v1816_v36, 1326507024  ;;  %v1906_v63 = vshll.u32 %v2554_v4, %v1903_v29 }
 0x10e   :  { %v1827_v55 = vsel %vm1819_vm5, %v1810_v27, %v1826_v35  ;;  %v1831_v11 = vsel %vm1819_vm5, %v1813_v34, %v1830_v38  ;;  %v1824_v5 = vsel %vm1818_vm7, %v1821_v41, %v1823_v31  ;;  %v1907_v32 = vshrl.u32 %v2555_v57, %v1904_v46  ;;  %v864_v27 = vpop.f32.mrf.mxu1  ;;  %v961_v41 = vpop.f32.mrf.mxu0 }
 0x10f   :  { %v1828_v56 = vsel %vm1818_vm7, %v1825_v19, %v1827_v55  ;;  %v1832_v58 = vsel %vm1818_vm7, %v1829_v28, %v1831_v11  ;;  %v1909_v0 = vshll.u32 %v2555_v57, %v1903_v29  ;;  %v1910_v33 = vshrl.u32 %v2556_v59, %v1904_v46 }
 0x110   :  { %v3275_v61 = vmul.u32.u64.low %v3252_v1, %v1832_v58  ;;  %v3276_v24 = vmul.u32.u64.high %v3252_v1, %v1832_v58, %v3275_v61  ;;  %v3279_v26 = vmul.u32.u64.low %v3252_v1, %v1828_v56  ;;  %v3280_v10 = vmul.u32.u64.high %v3252_v1, %v1828_v56, %v3279_v26 }
 0x111   :  { %v1912_v45 = vshll.u32 %v2556_v59, %v1903_v29  ;;  %v1913_v48 = vshrl.u32 %v2557_v8, %v1904_v46  ;;  %v1915_v12 = vshll.u32 %v2557_v8, %v1903_v29  ;;  %v1916_v2 = vshrl.u32 %v2558_v17, %v1904_v46  ;;  %v1045_v44 = vpop.f32.mrf.mxu1 }
 0x112   :  { %v1908_v62 = vor.u32 %v1907_v32, %v1906_v63  ;;  %v1911_v9 = vor.u32 %v1910_v33, %v1909_v0  ;;  %v1918_v13 = vshll.u32 %v2558_v17, %v1903_v29  ;;  %v1919_v18 = vshrl.u32 %v2559_v7, %v1904_v46 }
 0x113   :  { %v1840_v15 = vmul.u32 %v3252_v1, %v1824_v5  ;;  %vm1842_vm8 = vc.u32 %v3276_v24, %v3279_v26  ;;  %v1843_v47 = vadd.s32 1, %v3280_v10  ;;  %v1914_v54 = vor.u32 %v1913_v48, %v1912_v45  ;;  %v1047_v32 = vpop.f32.mrf.mxu1 }
 0x114   :  { %v1905_v20 = vshrl.u32 %v2554_v4, %v1904_v46  ;;  %v1917_v23 = vor.u32 %v1916_v2, %v1915_v12  ;;  %v1920_v21 = vor.u32 %v1919_v18, %v1918_v13  ;;  %vm1921_vm9 = vcmp.lt.s32.totalorder %v1902_v60, 1 }
 0x115   :  { %v1844_v25 = vsel %vm1842_vm8, %v1843_v47, %v3280_v10  ;;  %vm1923_vm10 = vcmp.lt.s32.totalorder %v1902_v60, 3  ;;  %vm1924_vm11 = vcmp.lt.s32.totalorder %v1902_v60, 4  ;;  %v1929_v34 = vsel %vm1921_vm9, %v1908_v62, %v1911_v9 }
 0x116   :  { %v1845_v36 = vadd.s32 %v1844_v25, %v1840_v15  ;;  %v1926_v29 = vsel %vm1924_vm11, %v1914_v54, 2102212464  ;;  %v1930_v1 = vsel %vm1924_vm11, %v1917_v23, 920167782  ;;  %v1933_v40 = vsel %vm1921_vm9, %v1911_v9, %v1914_v54  ;;  %v1153_v55 = vpop.f32.mrf.mxu0 }
 0x117   :  { %vm1922_vm12 = vcmp.lt.s32.totalorder %v1902_v60, 2  ;;  %v1925_v19 = vsel %vm1921_vm9, %v1905_v20, %v1908_v62  ;;  %v1931_v28 = vsel %vm1923_vm10, %v1914_v54, %v1930_v1  ;;  %v1934_v31 = vsel %vm1924_vm11, %v1920_v21, 1326507024 }
 0x118   :  { %v1846_v35 = vadd.s32 536870912, %v1845_v36  ;;  %v1927_v38 = vsel %vm1923_vm10, %v1911_v9, %v1926_v29  ;;  %v1932_v46 = vsel %vm1922_vm12, %v1929_v34, %v1931_v28  ;;  %v1935_v49 = vsel %vm1923_vm10, %v1917_v23, %v1934_v31  ;;  %v1155_v12 = vpop.f32.mrf.mxu0 }
 0x119   :  { %v1936_v11 = vsel %vm1922_vm12, %v1933_v40, %v1935_v49  ;;  %v3303_v5 = vmul.u32.u64.low %v3255_v53, %v1932_v46  ;;  %v3304_v56 = vmul.u32.u64.high %v3255_v53, %v1932_v46, %v3303_v5  ;;  %v865_v58 = vadd.f32 %v864_v27, %v732_v37 }
 0x11a   :  { %v1847_v61 = vshrl.u32 %v1846_v35, 30  ;;  %v3308_v10 = vmul.u32.u64.low %v3255_v53, %v1936_v11  ;;  %v3309_v63 = vmul.u32.u64.high %v3255_v53, %v1936_v11, %v3308_v10  ;;  %v1928_v0 = vsel %vm1922_vm12, %v1925_v19, %v1927_v38 }
 0x11b   :  { %v960_v33 = vadd.f32 %v959_v14, %v863_v50  ;;  %v962_v45 = vadd.f32 %v961_v41, %v865_v58  ;;  %v1765_v60 = vsub.s32 2, %v3219_v22  ;;  %v1769_v2 = vsub.s32 3, %v3219_v22 }
 0x11c   :  { %v1848_v48 = vshll.u32 %v1847_v61, 30  ;;  %v1947_v62 = vadd.s32 1, %v3304_v56  ;;  %v1944_v18 = vmul.u32 %v3255_v53, %v1928_v0  ;;  %vm1946_vm13 = vc.u32 %v3309_v63, %v3303_v5 }
 0x11d   :  { %v1046_v9 = vadd.f32 %v1045_v44, %v960_v33  ;;  %v1048_v13 = vadd.f32 %v1047_v32, %v962_v45  ;;  %v1766_v54 = vrot.slane %v3225_v39, %v1765_v60  ;;  %v1770_v27 = vrot.slane %v3225_v39, %v1769_v2 }
 0x11e   :  { %v1849_v37 = vsub.s32 %v1845_v36, %v1848_v48  ;;  %v1948_v50 = vsel %vm1946_vm13, %v1947_v62, %v3304_v56  ;;  %v1871_v53 = vsub.s32 4, %v1847_v61  ;;  %v1841_v45 = vadd.s32 %v3279_v26, %v3276_v24 }
 0x11f   :  { %v1237_v15 = vpop.f32.mrf.mxu1  ;;  %v1154_v14 = vadd.f32 %v1153_v55, %v1046_v9  ;;  %v1156_v47 = vadd.f32 %v1155_v12, %v1048_v13  ;;  %v1949_v23 = vadd.s32 %v1948_v50, %v1944_v18  ;;  %v3350_v55 = vld [vmem:[%s3683_s3] sm:$0x1f] }
 0x120   :  { %v1851_v20 = vsub.s32 0, %v1849_v37  ;;  %v1872_v19 = vsel %vm1787_vm14, %v1871_v53, %v1847_v61  ;;  %v3364_v62 = vrot.slane %v3350_v55, %v1757_v3 }
 0x121   :  { %v1239_v21 = vpop.f32.mrf.mxu1  ;;  %v3324_v25 = vadd.f32 %v1237_v15, %v1154_v14  ;;  %v1950_v29 = vadd.s32 536870912, %v1949_v23  ;;  %v1874_v58 = vsel %vm3343_vm15, 0, %v1872_v19 }
 0x122   :  { %v3326_v34 = vadd.f32 %v1239_v21, %v1156_v47  ;;  %v2353_v36 = vmin.u32 %v1851_v20, %v1849_v37  ;;  %v1878_v9 = vadd.s32 3, %v1874_v58  ;;  %vm2332_vm13 = vcmp.gt.f32.partialorder %v3364_v62, 0.5 }
 0x123   :  { %v3329_v1 = vadd.f32 %v1766_v54, %v3324_v25  ;;  %v1951_v28 = vshrl.u32 %v1950_v29, 30  ;;  %v1945_v29 = vadd.s32 %v3303_v5, %v3309_v63 }
 0x124   :  { %v1853_v40 = vclz %v2353_v36  ;;  %v3333_v41 = vadd.f32 %v1770_v27, %v3326_v34  ;;  %v3375_v36 = vand.u32 3, %v1878_v9 }
 0x125   :  { %v3335_v44 = vpop.f32.mrf.mxu0  ;;  %v1993_v31 = vand.u32 2147483647, %v3329_v1  ;;  %v1996_v35 = vand.u32 2139095040, %v3329_v1  ;;  %v1952_v11 = vshll.u32 %v1951_v28, 30  ;;  %v1975_v61 = vsub.s32 4, %v1951_v28 }
 0x126   :  { %v2354_v38 = vadd.s32 4294967294, %v1853_v40  ;;  %v2100_v10 = vand.u32 2139095040, %v3333_v41  ;;  %vm1881_vm10 = vcmp.eq.s32.totalorder %v3375_v36, 0  ;;  %vm1884_vm11 = vcmp.eq.s32.totalorder %v3375_v36, 2 }
 0x127   :  { %v2428_v46 = vpop.f32.mrf.mxu0  ;;  %v1997_v56 = vshrl.u32 %v1996_v35, 23  ;;  %v3355_v0 = vsub.s32 %v1949_v23, %v1952_v11  ;;  %v2000_v33 = vand.u32 8388607, %v1993_v31  ;;  %v3373_v26 = vsel %vm1891_vm1, %v1975_v61, %v1951_v28 }
 0x128   :  { %vm2355_vm0 = vcmp.lt.s32.totalorder %v2354_v38, 0  ;;  %v2101_v47 = vshrl.u32 %v2100_v10, 23  ;;  %v1978_v28 = vsel %vm3379_vm3, 0, %v3373_v26  ;;  %vm1880_vm12 = vcmp.lt.s32.totalorder %v3375_v36, 2 }
 0x129   :  { %v1856_v32 = vsel %vm2355_vm0, 0, %v2354_v38  ;;  %v2360_v43 = vadd.s32 4294967169, %v1997_v56  ;;  %v1955_v13 = vsub.s32 0, %v3355_v0  ;;  %v2001_v3 = vor.u32 8388608, %v2000_v33 }
 0x12a   :  { %v1857_v48 = vsub.s32 32, %v1856_v32  ;;  %v1861_v12 = vsub.s32 4294967266, %v1856_v32  ;;  %v1858_v15 = vshll.u32 %v1849_v37, %v1856_v32  ;;  %v2364_v27 = vadd.s32 4294967169, %v2101_v47 }
 0x12b   :  { %v2003_v18 = vadd.s32 1, %v2360_v43  ;;  %v2357_v24 = vmin.u32 %v1955_v13, %v3355_v0  ;;  %v2097_v38 = vand.u32 2147483647, %v3333_v41  ;;  %v3391_v6 = vshll.u32 %v2001_v3, 8 }
 0x12c   :  { %v1859_v50 = vshrl.u32 %v1841_v45, %v1857_v48  ;;  %v1862_v14 = vadd.s32 127, %v1861_v12  ;;  %v2107_v63 = vadd.s32 1, %v2364_v27 }
 0x12d   :  { %v3368_v54 = vpop.f32.mrf.mxu1  ;;  %vm2004_vm2 = vcmp.gt.s32.totalorder %v2003_v18, 0  ;;  %v1957_v40 = vclz %v2357_v24 }
 0x12e   :  { %v1860_v20 = vor.u32 %v1859_v50, %v1858_v15  ;;  %v1863_v23 = vshll.u32 %v1862_v14, 23  ;;  %v2005_v21 = vsel %vm2004_vm2, %v2003_v18, 0  ;;  %vm2108_vm9 = vcmp.gt.s32.totalorder %v2107_v63, 0 }
 0x12f   :  { %v2443_v53 = vpop.f32.mrf.mxu1  ;;  %v2007_v35 = vand.u32 31, %v2005_v21  ;;  %v2358_v11 = vadd.s32 4294967294, %v1957_v40  ;;  %v3389_v56 = vshrl.u32 %v2005_v21, 5 }
 0x130   :  { %v1864_v19 = vor.u32 4788187, %v1863_v23  ;;  %v1867_v46 = vcvt.s32.f32 %v1860_v20 }
 0x131   :  { %v2008_v10 = vsub.s32 32, %v2007_v35  ;;  %v2010_v5 = vshll.u32 %v2554_v4, %v2007_v35  ;;  %vm2359_vm4 = vcmp.lt.s32.totalorder %v2358_v11, 0  ;;  %v2013_v32 = vshll.u32 %v2555_v57, %v2007_v35 }
 0x132   :  { %v3393_v58 = vpop.f32.mrf.mxu0  ;;  %v1865_v61 = vand.u32 2147483647, %v1864_v19  ;;  %v2016_v43 = vshll.u32 %v2556_v59, %v2007_v35  ;;  %v2019_v33 = vshll.u32 %v2557_v8, %v2007_v35  ;;  %v1960_v12 = vsel %vm2359_vm4, 0, %v2358_v11 }
 0x133   :  { %v2011_v9 = vshrl.u32 %v2555_v57, %v2008_v10  ;;  %v2022_v13 = vshll.u32 %v2558_v17, %v2007_v35  ;;  %v1961_v18 = vsub.s32 32, %v1960_v12  ;;  %v1965_v15 = vsub.s32 4294967266, %v1960_v12 }
 0x134   :  { %v2458_v45 = vpop.f32.mrf.mxu0  ;;  %v1868_v48 = vmul.f32 %v1867_v46, %v1865_v61  ;;  %v2009_v50 = vshrl.u32 %v2554_v4, %v2008_v10  ;;  %v2014_v14 = vshrl.u32 %v2556_v59, %v2008_v10  ;;  %v1962_v24 = vshll.u32 %v3355_v0, %v1960_v12 }
 0x135   :  { %v2017_v3 = vshrl.u32 %v2557_v8, %v2008_v10  ;;  %v2020_v20 = vshrl.u32 %v2558_v17, %v2008_v10  ;;  %v1963_v23 = vshrl.u32 %v1945_v29, %v1961_v18  ;;  %v1966_v21 = vadd.s32 127, %v1965_v15 }
 0x136   :  { %v1869_v47 = vxor.u32 2147483648, %v1868_v48  ;;  %v2012_v27 = vor.u32 %v2011_v9, %v2010_v5  ;;  %v2023_v53 = vshrl.u32 %v2559_v7, %v2008_v10  ;;  %v2015_v19 = vor.u32 %v2014_v14, %v2013_v32 }
 0x137   :  { %v2018_v35 = vor.u32 %v2017_v3, %v2016_v43  ;;  %v2021_v46 = vor.u32 %v2020_v20, %v2019_v33  ;;  %v1964_v0 = vor.u32 %v1963_v23, %v1962_v24  ;;  %v1967_v61 = vshll.u32 %v1966_v21, 23 }
 0x138   :  { %v1870_v40 = vsel %vm1787_vm14, %v1869_v47, %v1868_v48  ;;  %v2024_v45 = vor.u32 %v2023_v53, %v2022_v13  ;;  %vm2025_vm5 = vcmp.lt.s32.totalorder %v3389_v56, 1  ;;  %vm2026_vm6 = vcmp.lt.s32.totalorder %v3389_v56, 2 }
 0x139   :  { %v1873_v11 = vsel %vm3343_vm15, %v3237_v16, %v1870_v40  ;;  %vm2027_vm7 = vcmp.lt.s32.totalorder %v3389_v56, 3  ;;  %v1968_v10 = vor.u32 4788187, %v1967_v61  ;;  %v1971_v5 = vcvt.s32.f32 %v1964_v0 }
 0x13a   :  { %2532 = vcosq.f32 %v1873_v11  ;;  %vm2028_vm8 = vcmp.lt.s32.totalorder %v3389_v56, 4  ;;  %v2033_v49 = vsel %vm2025_vm5, %v2012_v27, %v2015_v19  ;;  %v2037_v33 = vsel %vm2025_vm5, %v2015_v19, %v2018_v35 }
 0x13b   :  { %v3415_v29 = vpop.f32.mrf.mxu1  ;;  %2534 = vsinq.f32 %v1873_v11  ;;  %v2030_v32 = vsel %vm2028_vm8, %v2018_v35, 2102212464  ;;  %v2034_v43 = vsel %vm2028_vm8, %v2021_v46, 920167782  ;;  %v1969_v12 = vand.u32 2147483647, %v1968_v10 }
 0x13c   :  { %v2029_v9 = vsel %vm2025_vm5, %v2009_v50, %v2012_v27  ;;  %v2035_v13 = vsel %vm2027_vm7, %v2018_v35, %v2034_v43  ;;  %v2038_v18 = vsel %vm2028_vm8, %v2024_v45, 1326507024  ;;  %v2031_v15 = vsel %vm2027_vm7, %v2015_v19, %v2030_v32 }
 0x13d   :  { %v2473_v48 = vpop.f32.mrf.mxu1  ;;  %v2036_v14 = vsel %vm2026_vm6, %v2033_v49, %v2035_v13  ;;  %v2039_v47 = vsel %vm2027_vm7, %v2021_v46, %v2038_v18  ;;  %v1972_v24 = vmul.f32 %v1971_v5, %v1969_v12  ;;  %v2104_v53 = vand.u32 8388607, %v2097_v38 }
 0x13e   :  { %v2040_v3 = vsel %vm2026_vm6, %v2037_v33, %v2039_v47  ;;  %v3429_v50 = vmul.u32.u64.low %v3391_v6, %v2036_v14  ;;  %v3430_v20 = vmul.u32.u64.high %v3391_v6, %v2036_v14, %v3429_v50  ;;  %v2109_v40 = vsel %vm2108_vm9, %v2107_v63, 0 }
 0x13f   :  { %v3436_v21 = vmul.u32.u64.low %v3391_v6, %v2040_v3  ;;  %v3437_v27 = vmul.u32.u64.high %v3391_v6, %v2040_v3, %v3436_v21  ;;  %v1973_v19 = vxor.u32 2147483648, %v1972_v24  ;;  %v2032_v35 = vsel %vm2026_vm6, %v2029_v9, %v2031_v15 }
 0x140   :  { %v3433_v23 = vpop.f32.mrf.mxu0  ;;  %v2111_v46 = vand.u32 31, %v2109_v40  ;;  %v3448_v0 = vrot.slane %v3350_v55, %v1761_v30  ;;  %v1773_v61 = vsub.s32 4, %v3219_v22  ;;  %v1982_v63 = vadd.s32 3, %v1978_v28 }
 0x141   :  { %v1974_v56 = vsel %vm1891_vm1, %v1973_v19, %v1972_v24  ;;  %v2051_v45 = vadd.s32 1, %v3430_v20  ;;  %vm1877_vm14 = vweird.f32 %v3237_v16  ;;  %v2048_v5 = vmul.u32 %v3391_v6, %v2032_v35 }
 0x142   :  { %v2488_v11 = vpop.f32.mrf.mxu0  ;;  %v2112_v10 = vsub.s32 32, %v2111_v46  ;;  %v1977_v30 = vsel %vm3379_vm3, %v3244_v51, %v1974_v56  ;;  %vm2050_vm15 = vc.u32 %v3437_v27, %v3429_v50  ;;  %v2105_v32 = vor.u32 8388608, %v2104_v53 }
 0x143   :  { %2536 = vcosq.f32 %v1977_v30  ;;  %v2052_v49 = vsel %vm2050_vm15, %v2051_v45, %v3430_v20  ;;  %v3468_v26 = vshrl.u32 %v2109_v40, 5  ;;  %v2114_v33 = vshll.u32 %v2554_v4, %v2111_v46 }
 0x144   :  { %v2115_v28 = vshrl.u32 %v2555_v57, %v2112_v10  ;;  %2538 = vsinq.f32 %v1977_v30  ;;  %v2053_v43 = vadd.s32 %v2052_v49, %v2048_v5  ;;  %v2118_v37 = vshrl.u32 %v2556_v59, %v2112_v10 }
 0x145   :  { %v2117_v6 = vshll.u32 %v2555_v57, %v2111_v46  ;;  %v2121_v12 = vshrl.u32 %v2557_v8, %v2112_v10  ;;  %v2123_v9 = vshll.u32 %v2557_v8, %v2111_v46  ;;  %v2124_v13 = vshrl.u32 %v2558_v17, %v2112_v10 }
 0x146   :  { %v2054_v47 = vadd.s32 536870912, %v2053_v43  ;;  %v2116_v24 = vor.u32 %v2115_v28, %v2114_v33  ;;  %v2120_v3 = vshll.u32 %v2556_v59, %v2111_v46  ;;  %v2127_v40 = vshrl.u32 %v2559_v7, %v2112_v10 }
 0x147   :  { %v2533_v48 = vpop.eup %2532  ;;  %v2119_v21 = vor.u32 %v2118_v37, %v2117_v6  ;;  %v2125_v53 = vor.u32 %v2124_v13, %v2123_v9  ;;  %v2126_v45 = vshll.u32 %v2558_v17, %v2111_v46  ;;  %v1983_v5 = vand.u32 3, %v1982_v63 }
 0x148   :  { %v3477_v18 = vpop.f32.mrf.mxu1  ;;  %v2535_v15 = vpop.eup %2534  ;;  %v1885_v14 = vxor.u32 2147483648, %v2533_v48  ;;  %v3483_v11 = vshrl.u32 %v2054_v47, 30  ;;  %v2122_v56 = vor.u32 %v2121_v12, %v2120_v3  ;;  %vm2129_vm0 = vcmp.lt.s32.totalorder %v3468_v26, 1 }
 0x149   :  { %v1882_v20 = vxor.u32 2147483648, %v2535_v15  ;;  %v2145_v49 = vshll.u32 %v2105_v32, 8  ;;  %v2128_v37 = vor.u32 %v2127_v40, %v2126_v45  ;;  %vm2132_vm1 = vcmp.lt.s32.totalorder %v3468_v26, 4 }
 0x14a   :  { %v2503_v19 = vpop.f32.mrf.mxu1  ;;  %v1886_v35 = vsel %vm1884_vm11, %v1885_v14, %v2535_v15  ;;  %v2056_v33 = vshll.u32 %v3483_v11, 30  ;;  %v2113_v46 = vshrl.u32 %v2554_v4, %v2112_v10  ;;  %v2138_v63 = vsel %vm2132_vm1, %v2125_v53, 920167782 }
 0x14b   :  { %v1883_v30 = vsel %vm1881_vm10, %v2533_v48, %v1882_v20  ;;  %v2137_v48 = vsel %vm2129_vm0, %v2116_v24, %v2119_v21  ;;  %vm2131_vm2 = vcmp.lt.s32.totalorder %v3468_v26, 3  ;;  %v2134_v16 = vsel %vm2132_vm1, %v2122_v56, 2102212464 }
 0x14c   :  { %v1887_v28 = vsel %vm1880_vm12, %v1883_v30, %v1886_v35  ;;  %v3503_v32 = vsub.s32 %v2053_v43, %v2056_v33  ;;  %vm2130_vm3 = vcmp.lt.s32.totalorder %v3468_v26, 2  ;;  %v2139_v10 = vsel %vm2131_vm2, %v2122_v56, %v2138_v63 }
 0x14d   :  { %v1888_v6 = vsel %vm1877_vm14, nan, %v1887_v28  ;;  %v2141_v12 = vsel %vm2129_vm0, %v2119_v21, %v2122_v56  ;;  %v2133_v43 = vsel %vm2129_vm0, %v2113_v46, %v2116_v24  ;;  %v2140_v9 = vsel %vm2130_vm3, %v2137_v48, %v2139_v10 }
 0x14e   :  { %v2337_v36 = vsel %vm2332_vm13, %v3231_v52, %v1888_v6  ;;  %v1421_v52 = vadd.f32 %v3368_v54, %v3335_v44  ;;  %v2059_v62 = vsub.s32 0, %v3503_v32  ;;  %v2142_v13 = vsel %vm2132_vm1, %v2128_v37, 1326507024 }
 0x14f   :  { %2342 = vst [vmem:[%s3684_s4] sm:$0xff] %v2337_v36  ;;  %v2135_v15 = vsel %vm2131_vm2, %v2119_v21, %v2134_v16  ;;  %v2143_v14 = vsel %vm2131_vm2, %v2125_v53, %v2142_v13  ;;  %v3523_v47 = vmul.u32.u64.low %v2145_v49, %v2140_v9  ;;  %v3524_v3 = vmul.u32.u64.high %v2145_v49, %v2140_v9, %v3523_v47 }
 0x150   :  { %v2537_v20 = vpop.eup %2536  ;;  %vm2333_vm4 = vcmp.gt.f32.partialorder %v3448_v0, 0.5  ;;  %v2361_v44 = vmin.u32 %v2059_v62, %v3503_v32  ;;  %v2144_v54 = vsel %vm2130_vm3, %v2141_v12, %v2143_v14  ;;  %v1774_v24 = vrot.slane %v3225_v39, %v1773_v61 }
 0x151   :  { %v2539_v40 = vpop.eup %2538  ;;  %v1989_v19 = vxor.u32 2147483648, %v2537_v20  ;;  %v3534_v21 = vmul.u32.u64.low %v2145_v49, %v2144_v54  ;;  %v3535_v53 = vmul.u32.u64.high %v2145_v49, %v2144_v54, %v3534_v21  ;;  %v1505_v35 = vadd.f32 %v3393_v58, %v1421_v52 }
 0x152   :  { %v1986_v56 = vxor.u32 2147483648, %v2539_v40  ;;  %vm1988_vm5 = vcmp.eq.s32.totalorder %v1983_v5, 2  ;;  %v2061_v45 = vclz %v2361_v44  ;;  %v2136_v30 = vsel %vm2130_vm3, %v2133_v43, %v2135_v15 }
 0x153   :  { %vm1985_vm6 = vcmp.eq.s32.totalorder %v1983_v5, 0  ;;  %v1990_v28 = vsel %vm1988_vm5, %v1989_v19, %v2539_v40  ;;  %v2155_v33 = vadd.s32 1, %v3524_v3  ;;  %v1584_v37 = vadd.f32 %v3415_v29, %v1505_v35 }
 0x154   :  { %vm1981_vm7 = vweird.f32 %v3244_v51  ;;  %vm1984_vm8 = vcmp.lt.s32.totalorder %v1983_v5, 2  ;;  %v1987_v39 = vsel %vm1985_vm6, %v2537_v20, %v1986_v56  ;;  %v2362_v6 = vadd.s32 4294967294, %v2061_v45 }
 0x155   :  { %v1991_v46 = vsel %vm1984_vm8, %v1987_v39, %v1990_v28  ;;  %v2152_v48 = vmul.u32 %v2145_v49, %v2136_v30  ;;  %vm2154_vm9 = vc.u32 %v3535_v53, %v3523_v47  ;;  %v1673_v58 = vadd.f32 %v3433_v23, %v1584_v37 }
 0x156   :  { %v1992_v26 = vsel %vm1981_vm7, nan, %v1991_v46  ;;  %vm2363_vm10 = vcmp.lt.s32.totalorder %v2362_v6, 0  ;;  %v2156_v63 = vsel %vm2154_vm9, %v2155_v33, %v3524_v3  ;;  %v2049_v23 = vadd.s32 %v3429_v50, %v3437_v27 }
 0x157   :  { %v2338_v29 = vsel %vm2333_vm4, %v3239_v42, %v1992_v26  ;;  %v2064_v36 = vsel %vm2363_vm10, 0, %v2362_v6  ;;  %v2157_v51 = vadd.s32 %v2156_v63, %v2152_v48  ;;  %v3551_v5 = vadd.f32 %v3477_v18, %v1673_v58 }
 0x158   :  { %2343 = vst [vmem:[%s3684_s4 + $0x8] sm:$0xff] %v2338_v29  ;;  %v2065_v49 = vsub.s32 32, %v2064_v36  ;;  %v2069_v16 = vsub.s32 4294967266, %v2064_v36  ;;  %v2079_v10 = vsub.s32 4, %v3483_v11  ;;  %v2066_v42 = vshll.u32 %v3503_v32, %v2064_v36 }
 0x159   :  { %v2158_v12 = vadd.s32 536870912, %v2157_v51  ;;  %v3560_v0 = vadd.f32 %v1774_v24, %v3551_v5  ;;  %vm1995_vm11 = vcmp.lt.s32.totalorder %v3329_v1, 0  ;;  %vm3574_vm12 = vcmp.le.f32.partialorder %v1993_v31, 0.7853982 }
 0x15a   :  { %v2067_v52 = vshrl.u32 %v2049_v23, %v2065_v49  ;;  %v2070_v18 = vadd.s32 127, %v2069_v16  ;;  %v2080_v13 = vsel %vm1995_vm11, %v2079_v10, %v3483_v11  ;;  %v3589_v6 = vrot.slane %v3350_v55, %v1765_v60 }
 0x15b   :  { %v3564_v62 = vshrl.u32 %v2158_v12, 30  ;;  %v2201_v43 = vand.u32 2147483647, %v3560_v0  ;;  %v2204_v50 = vand.u32 2139095040, %v3560_v0  ;;  %v2082_v20 = vsel %vm3574_vm12, 0, %v2080_v13 }
 0x15c   :  { %v2068_v27 = vor.u32 %v2067_v52, %v2066_v42  ;;  %v2071_v9 = vshll.u32 %v2070_v18, 23  ;;  %v2086_v56 = vadd.s32 3, %v2082_v20  ;;  %v2153_v58 = vadd.s32 %v3523_v47, %v3535_v53 }
 0x15d   :  { %v2160_v15 = vshll.u32 %v3564_v62, 30  ;;  %v2205_v14 = vshrl.u32 %v2204_v50, 23  ;;  %v2208_v24 = vand.u32 8388607, %v2201_v43  ;;  %vm2334_vm3 = vcmp.gt.f32.partialorder %v3589_v6, 0.5 }
 0x15e   :  { %v2072_v3 = vor.u32 4788187, %v2071_v9  ;;  %v2075_v11 = vcvt.s32.f32 %v2068_v27  ;;  %v3584_v39 = vand.u32 3, %v2086_v56  ;;  %vm3626_vm4 = vcmp.le.f32.partialorder %v2097_v38, 0.7853982 }
 0x15f   :  { %v2161_v44 = vsub.s32 %v2157_v51, %v2160_v15  ;;  %v2368_v54 = vadd.s32 4294967169, %v2205_v14  ;;  %v2209_v31 = vor.u32 8388608, %v2208_v24  ;;  %vm2099_vm5 = vcmp.lt.s32.totalorder %v3333_v41, 0 }
 0x160   :  { %v2073_v40 = vand.u32 2147483647, %v2072_v3  ;;  %vm2092_vm6 = vcmp.eq.s32.totalorder %v3584_v39, 2  ;;  %vm2088_vm7 = vcmp.lt.s32.totalorder %v3584_v39, 2  ;;  %vm2089_vm8 = vcmp.eq.s32.totalorder %v3584_v39, 0 }
 0x161   :  { %v2163_v19 = vsub.s32 0, %v2161_v44  ;;  %v2211_v21 = vadd.s32 1, %v2368_v54  ;;  %v3596_v63 = vshll.u32 %v2209_v31, 8  ;;  %v2183_v38 = vsub.s32 4, %v3564_v62 }
 0x162   :  { %v2076_v35 = vmul.f32 %v2075_v11, %v2073_v40  ;;  %vm2085_vm10 = vweird.f32 %v3329_v1 }
 0x163   :  { %v2365_v45 = vmin.u32 %v2163_v19, %v2161_v44  ;;  %vm2212_vm13 = vcmp.gt.s32.totalorder %v2211_v21, 0 }
 0x164   :  { %v2077_v30 = vxor.u32 2147483648, %v2076_v35  ;;  %v2213_v28 = vsel %vm2212_vm13, %v2211_v21, 0 }
 0x165   :  { %v2165_v33 = vclz %v2365_v45  ;;  %v2215_v46 = vand.u32 31, %v2213_v28  ;;  %v2214_v29 = vshrl.u32 %v2213_v28, 5 }
 0x166   :  { %v2078_v37 = vsel %vm1995_vm11, %v2077_v30, %v2076_v35 }
 0x167   :  { %v2081_v48 = vsel %vm3574_vm12, %v3329_v1, %v2078_v37  ;;  %v2366_v26 = vadd.s32 4294967294, %v2165_v33  ;;  %v2216_v36 = vsub.s32 32, %v2215_v46  ;;  %v2218_v51 = vshll.u32 %v2554_v4, %v2215_v46 }
 0x168   :  { %2540 = vcosq.f32 %v2081_v48  ;;  %v2221_v60 = vshll.u32 %v2555_v57, %v2215_v46  ;;  %v2224_v23 = vshll.u32 %v2556_v59, %v2215_v46  ;;  %v2227_v47 = vshll.u32 %v2557_v8, %v2215_v46 }
 0x169   :  { %2542 = vsinq.f32 %v2081_v48  ;;  %vm2367_vm14 = vcmp.lt.s32.totalorder %v2366_v26, 0  ;;  %v2219_v16 = vshrl.u32 %v2555_v57, %v2216_v36  ;;  %v2222_v10 = vshrl.u32 %v2556_v59, %v2216_v36 }
 0x16a   :  { %v2168_v49 = vsel %vm2367_vm14, 0, %v2366_v26  ;;  %v2225_v52 = vshrl.u32 %v2557_v8, %v2216_v36  ;;  %v2228_v27 = vshrl.u32 %v2558_v17, %v2216_v36  ;;  %v2230_v9 = vshll.u32 %v2558_v17, %v2215_v46 }
 0x16b   :  { %v2169_v53 = vsub.s32 32, %v2168_v49  ;;  %v2170_v12 = vshll.u32 %v2161_v44, %v2168_v49  ;;  %v2173_v42 = vsub.s32 4294967266, %v2168_v49  ;;  %v2220_v18 = vor.u32 %v2219_v16, %v2218_v51 }
 0x16c   :  { %v2223_v50 = vor.u32 %v2222_v10, %v2221_v60  ;;  %v2226_v14 = vor.u32 %v2225_v52, %v2224_v23  ;;  %v2231_v57 = vshrl.u32 %v2559_v7, %v2216_v36  ;;  %v2217_v59 = vshrl.u32 %v2554_v4, %v2216_v36 }
 0x16d   :  { %v2171_v13 = vshrl.u32 %v2153_v58, %v2169_v53  ;;  %v2174_v15 = vadd.s32 127, %v2173_v42  ;;  %v2229_v32 = vor.u32 %v2228_v27, %v2227_v47  ;;  %vm2233_vm15 = vcmp.lt.s32.totalorder %v2214_v29, 1 }
 0x16e   :  { %vm2234_vm0 = vcmp.lt.s32.totalorder %v2214_v29, 2  ;;  %v2232_v44 = vor.u32 %v2231_v57, %v2230_v9  ;;  %vm2236_vm1 = vcmp.lt.s32.totalorder %v2214_v29, 4  ;;  %vm2235_vm2 = vcmp.lt.s32.totalorder %v2214_v29, 3 }
 0x16f   :  { %v2172_v3 = vor.u32 %v2171_v13, %v2170_v12  ;;  %v2175_v20 = vshll.u32 %v2174_v15, 23  ;;  %v2238_v8 = vsel %vm2236_vm1, %v2226_v14, 2102212464  ;;  %v2241_v54 = vsel %vm2233_vm15, %v2220_v18, %v2223_v50 }
 0x170   :  { %v2242_v24 = vsel %vm2236_vm1, %v2229_v32, 920167782  ;;  %v2237_v11 = vsel %vm2233_vm15, %v2217_v59, %v2220_v18  ;;  %v2239_v7 = vsel %vm2235_vm2, %v2223_v50, %v2238_v8  ;;  %v2245_v21 = vsel %vm2233_vm15, %v2223_v50, %v2226_v14 }
 0x171   :  { %v2176_v17 = vor.u32 4788187, %v2175_v20  ;;  %v2179_v40 = vcvt.s32.f32 %v2172_v3  ;;  %v2243_v19 = vsel %vm2235_vm2, %v2226_v14, %v2242_v24  ;;  %v2246_v35 = vsel %vm2236_vm1, %v2232_v44, 1326507024 }
 0x172   :  { %v2244_v4 = vsel %vm2234_vm0, %v2241_v54, %v2243_v19  ;;  %v2247_v45 = vsel %vm2235_vm2, %v2229_v32, %v2246_v35  ;;  %v2240_v51 = vsel %vm2234_vm0, %v2237_v11, %v2239_v7  ;;  %vm2189_vm15 = vweird.f32 %v3333_v41 }
 0x173   :  { %v2177_v56 = vand.u32 2147483647, %v2176_v17  ;;  %v3614_v31 = vmul.u32.u64.low %v3596_v63, %v2244_v4  ;;  %v3615_v30 = vmul.u32.u64.high %v3596_v63, %v2244_v4, %v3614_v31  ;;  %v2248_v28 = vsel %vm2234_vm0, %v2245_v21, %v2247_v45 }
 0x174   :  { %v3621_v46 = vmul.u32.u64.low %v3596_v63, %v2248_v28  ;;  %v3622_v48 = vmul.u32.u64.high %v3596_v63, %v2248_v28, %v3621_v46  ;;  %v2256_v29 = vmul.u32 %v3596_v63, %v2240_v51  ;;  %v2184_v63 = vsel %vm2099_vm5, %v2183_v38, %v3564_v62 }
 0x175   :  { %v2541_v33 = vpop.eup %2540  ;;  %v2180_v37 = vmul.f32 %v2179_v40, %v2177_v56  ;;  %v2259_v49 = vadd.s32 1, %v3615_v30  ;;  %v2186_v50 = vsel %vm3626_vm4, 0, %v2184_v63  ;;  %v2322_v62 = vrot.slane %v3350_v55, %v1769_v2 }
 0x176   :  { %v2543_v58 = vpop.eup %2542  ;;  %v2093_v26 = vxor.u32 2147483648, %v2541_v33  ;;  %vm2258_vm9 = vc.u32 %v3622_v48, %v3614_v31  ;;  %v2190_v13 = vadd.s32 3, %v2186_v50  ;;  %v2257_v2 = vadd.s32 %v3614_v31, %v3622_v48 }
 0x177   :  { %v2090_v60 = vxor.u32 2147483648, %v2543_v58  ;;  %v2181_v23 = vxor.u32 2147483648, %v2180_v37  ;;  %v2260_v39 = vsel %vm2258_vm9, %v2259_v49, %v3615_v30  ;;  %vm2335_vm14 = vcmp.gt.f32.partialorder %v2322_v62, 0.5 }
 0x178   :  { %v2094_v16 = vsel %vm2092_vm6, %v2093_v26, %v2543_v58  ;;  %v2261_v52 = vadd.s32 %v2260_v39, %v2256_v29  ;;  %v2191_v6 = vand.u32 3, %v2190_v13  ;;  %vm2203_vm1 = vcmp.lt.s32.totalorder %v3560_v0, 0 }
 0x179   :  { %v2091_v10 = vsel %vm2089_vm8, %v2541_v33, %v2090_v60  ;;  %v2182_v47 = vsel %vm2099_vm5, %v2181_v23, %v2180_v37  ;;  %vm2202_vm2 = vcmp.le.f32.partialorder %v2201_v43, 0.7853982  ;;  %v2326_v60 = vrot.slane %v3350_v55, %v1773_v61 }
 0x17a   :  { %v2095_v53 = vsel %vm2088_vm7, %v2091_v10, %v2094_v16  ;;  %v2185_v12 = vsel %vm3626_vm4, %v3333_v41, %v2182_v47  ;;  %v2262_v1 = vadd.s32 536870912, %v2261_v52  ;;  %vm2196_vm11 = vcmp.eq.s32.totalorder %v2191_v6, 2 }
 0x17b   :  { %v2096_v42 = vsel %vm2085_vm10, nan, %v2095_v53  ;;  %2544 = vcosq.f32 %v2185_v12  ;;  %vm2193_vm12 = vcmp.eq.s32.totalorder %v2191_v6, 0  ;;  %vm2192_vm13 = vcmp.lt.s32.totalorder %v2191_v6, 2 }
 0x17c   :  { %v2339_v18 = vsel %vm2334_vm3, %v3324_v25, %v2096_v42  ;;  %2546 = vsinq.f32 %v2185_v12  ;;  %v2263_v27 = vshrl.u32 %v2262_v1, 30  ;;  %vm2336_vm6 = vcmp.gt.f32.partialorder %v2326_v60, 0.5 }
 0x17d   :  { %2344 = vst [vmem:[%s3684_s4 + $0x10] sm:$0xff] %v2339_v18  ;;  %vm2293_vm7 = vweird.f32 %v3560_v0  ;;  %vm2346_vm8 = vcmask 916480  }
 0x17e   :  { %v2264_v9 = vshll.u32 %v2263_v27, 30 }
 0x180   :  { %v2265_v15 = vsub.s32 %v2261_v52, %v2264_v9 }
 0x182   :  { %v2267_v14 = vsub.s32 0, %v2265_v15 }
 0x184   :  { %v2369_v25 = vmin.u32 %v2267_v14, %v2265_v15 }
 0x186   :  { %v2269_v3 = vclz %v2369_v25 }
 0x188   :  { %v2545_v57 = vpop.eup %2544  ;;  %v2370_v8 = vadd.s32 4294967294, %v2269_v3 }
 0x189   :  { %v2547_v59 = vpop.eup %2546  ;;  %v2197_v32 = vxor.u32 2147483648, %v2545_v57 }
 0x18a   :  { %v2194_v20 = vxor.u32 2147483648, %v2547_v59  ;;  %vm2371_vm0 = vcmp.lt.s32.totalorder %v2370_v8, 0 }
 0x18b   :  { %v2198_v44 = vsel %vm2196_vm11, %v2197_v32, %v2547_v59  ;;  %v2272_v40 = vsel %vm2371_vm0, 0, %v2370_v8 }
 0x18c   :  { %v2195_v54 = vsel %vm2193_vm12, %v2545_v57, %v2194_v20  ;;  %v2273_v19 = vsub.s32 32, %v2272_v40  ;;  %v2277_v7 = vsub.s32 4294967266, %v2272_v40  ;;  %v2274_v4 = vshll.u32 %v2265_v15, %v2272_v40 }
 0x18d   :  { %v2199_v24 = vsel %vm2192_vm13, %v2195_v54, %v2198_v44 }
 0x18e   :  { %v2200_v17 = vsel %vm2189_vm15, nan, %v2199_v24  ;;  %v2275_v21 = vshrl.u32 %v2257_v2, %v2273_v19  ;;  %v2278_v35 = vadd.s32 127, %v2277_v7 }
 0x18f   :  { %v2340_v11 = vsel %vm2335_vm14, %v3326_v34, %v2200_v17  ;;  %v2287_v34 = vsub.s32 4, %v2263_v27 }
 0x190   :  { %2345 = vst [vmem:[%s3684_s4 + $0x18] sm:$0xff] %v2340_v11  ;;  %v2276_v56 = vor.u32 %v2275_v21, %v2274_v4  ;;  %v2279_v41 = vshll.u32 %v2278_v35, 23 }
 0x191   :  { %v2288_v48 = vsel %vm2203_vm1, %v2287_v34, %v2263_v27 }
 0x192   :  { %v2280_v45 = vor.u32 4788187, %v2279_v41  ;;  %v2283_v28 = vcvt.s32.f32 %v2276_v56  ;;  %v2290_v58 = vsel %vm2202_vm2, 0, %v2288_v48 }
 0x193   :  { %v2294_v26 = vadd.s32 3, %v2290_v58 }
 0x194   :  { %v2281_v30 = vand.u32 2147483647, %v2280_v45 }
 0x195   :  { %v2295_v36 = vand.u32 3, %v2294_v26 }
 0x196   :  { %v2284_v33 = vmul.f32 %v2283_v28, %v2281_v30 }
 0x197   :  { %vm2300_vm3 = vcmp.eq.s32.totalorder %v2295_v36, 2  ;;  %vm2297_vm4 = vcmp.eq.s32.totalorder %v2295_v36, 0  ;;  %vm2296_vm5 = vcmp.lt.s32.totalorder %v2295_v36, 2 }
 0x198   :  { %v2285_v37 = vxor.u32 2147483648, %v2284_v33 }
 0x19a   :  { %v2286_v31 = vsel %vm2203_vm1, %v2285_v37, %v2284_v33 }
 0x19b   :  { %v2289_v46 = vsel %vm2202_vm2, %v3560_v0, %v2286_v31 }
 0x19c   :  { %2548 = vcosq.f32 %v2289_v46 }
 0x19d   :  { %2550 = vsinq.f32 %v2289_v46 }
 0x1a9   :  { %v2549_v51 = vpop.eup %2548 }
 0x1aa   :  { %v2551_v23 = vpop.eup %2550  ;;  %v2301_v49 = vxor.u32 2147483648, %v2549_v51 }
 0x1ab   :  { %v2298_v16 = vxor.u32 2147483648, %v2551_v23 }
 0x1ac   :  { %v2302_v43 = vsel %vm2300_vm3, %v2301_v49, %v2551_v23 }
 0x1ad   :  { %v2299_v38 = vsel %vm2297_vm4, %v2549_v51, %v2298_v16 }
 0x1ae   :  { %v2303_v10 = vsel %vm2296_vm5, %v2299_v38, %v2302_v43 }
 0x1af   :  { %v2304_v47 = vsel %vm2293_vm7, nan, %v2303_v10 }
 0x1b0   :  { %v2341_v29 = vsel %vm2336_vm6, %v3551_v5, %v2304_v47 }
 0x1b1   :  { %2347 = vst.msk [vmem:[%s3684_s4 + $0x20] sm:$0xff] %vm2346_vm8, %v2341_v29 }

</bundles_post_ra>
